<compile_context>
chip_gen: v6e
topology: v6e:2x2x1
jax: 0.10.0
libtpu: 0.0.40
codegen_flags: <defaults>
</compile_context>

<pallas_src>
import jax
import jax.numpy as jnp
from jax.experimental import pallas as pl
from jax.experimental.pallas import tpu as pltpu

# ------------------ small config (consistent with the module) ------------------
B = 8                               # batch (>=8 fills the 8 vreg sublanes)
IMG_C, IMG_H, IMG_W = 3, 8, 8       # image (NCHW)
BACKBONE_FEATS = 64                 # stand-in for VGG19 classifier[:-1] output
FEATURE_SIZE = 32                   # feature_size
QST_VOCAB = 100                     # qst_vocab_size
ANS_VOCAB = 16                      # ans_vocab_size
QST_EMBED = 16                      # qst_embed_size (== HIDDEN so LSTM weights stack)
NUM_LSTM_LAYERS = 2                 # num_layers
HIDDEN = 16                         # hidden_size
SEQ = 8                             # question length
MUTAN_LAYERS = 5                    # MutanFusion num_layers

_VMEM = pl.BlockSpec(memory_space=pltpu.MemorySpace.VMEM)


# ------------------------------- fused kernel ----------------------------------
def vqa_fused_kernel(img_ref, emb_ref,
                     wb_ref, wfc_ref, bfc_ref,
                     w_ih_ref, w_hh_ref, b_lstm_ref,
                     wqfc_ref, bqfc_ref,
                     w_mutan_ref, b_mutan_ref,
                     w_mlp_ref, b_mlp_ref,
                     out_ref):
    Bv = img_ref.shape[0]
    H = HIDDEN
    F = FEATURE_SIZE
    T = emb_ref.shape[0] // Bv

    # ---------------- ImgEncoder: backbone -> fc -> L2 normalize ----------------
    # TODO(synk): the frozen pretrained VGG19 backbone has no clean in-script
    # equivalent; a deterministic linear+ReLU stand-in produces the
    # classifier[:-1] feature vector here.
    x_img = img_ref[...]                                             # (B, C*H*W)
    feats = jnp.maximum(
        jnp.dot(x_img, wb_ref[...], preferred_element_type=jnp.float32), 0.0)
    y = (jnp.dot(feats, wfc_ref[...], preferred_element_type=jnp.float32)
         + bfc_ref[...])                                             # (B, F)
    # L2 norm via rsqrt (EUP) instead of sqrt + divide (VALU).
    inv_norm = jax.lax.rsqrt(jnp.sum(y * y, axis=1, keepdims=True))
    img_feat = y * inv_norm

    # ------- QstEncoder: tanh(embed) -> multi-layer LSTM -> cat -> tanh -> fc ----
    # emb_ref is (T*B, E), rows t-major (row = t*B + b).
    x_seq = jnp.tanh(emb_ref[...])                                   # (T*B, E)
    states = []
    for l in range(NUM_LSTM_LAYERS):
        w_ih = w_ih_ref[l]                                           # (in, 4H)
        w_hh = w_hh_ref[l]                                           # (H, 4H)
        b = b_lstm_ref[l]                                            # (1, 4H) = b_ih+b_hh
        # Input-side projection hoisted out of the serial recurrence:
        proj = (jnp.dot(x_seq, w_ih, preferred_element_type=jnp.float32)
                + b)                                                 # (T*B, 4H)
        h = jnp.zeros((Bv, H), jnp.float32)
        c = jnp.zeros((Bv, H), jnp.float32)
        outs = []
        for t in range(T):
            gates = (proj[t * Bv:(t + 1) * Bv, :]
                     + jnp.dot(h, w_hh, preferred_element_type=jnp.float32))
            # PyTorch gate order: input, forget, cell(g), output
            i_g = jax.nn.sigmoid(gates[:, 0:H])
            f_g = jax.nn.sigmoid(gates[:, H:2 * H])
            g_g = jnp.tanh(gates[:, 2 * H:3 * H])
            o_g = jax.nn.sigmoid(gates[:, 3 * H:4 * H])
            c = f_g * c + i_g * g_g
            h = o_g * jnp.tanh(c)
            outs.append(h)
        x_seq = jnp.concatenate(outs, axis=0)                        # (T*B, H)
        states.append((h, c))

    # torch: cat((hidden, cell), 2) -> (L,B,2H); transpose(0,1); reshape(B, L*2H)
    qst = jnp.concatenate([s for hc in states for s in hc], axis=1)  # [h0,c0,h1,c1]
    qst = jnp.tanh(qst)
    qst_feat = (jnp.dot(qst, wqfc_ref[...], preferred_element_type=jnp.float32)
                + bqfc_ref[...])                                     # (B, F)

    # -------------------- MutanFusion (concat weights) + mlp --------------------
    # nn.Dropout(p=0.5) is identity at inference time.
    # 5 per-layer (F,F) Linears concatenated to one lane-dense (F, 5F) matmul
    # per modality; w_mutan_ref[0]/b_mutan_ref[0] = image path, [1] = question.
    x_hv = jnp.tanh(
        jnp.dot(img_feat, w_mutan_ref[0], preferred_element_type=jnp.float32)
        + b_mutan_ref[0])                                            # (B, 5F)
    x_hq = jnp.tanh(
        jnp.dot(qst_feat, w_mutan_ref[1], preferred_element_type=jnp.float32)
        + b_mutan_ref[1])                                            # (B, 5F)
    prod = x_hq * x_hv                                               # (B, 5F)
    # stack(x_mm, 1).sum(1) == sum of the 5 lane groups.
    acc = prod[:, 0:F]
    for i in range(1, MUTAN_LAYERS):
        acc = acc + prod[:, i * F:(i + 1) * F]
    fused = jnp.tanh(acc)                                            # (B, F)

    # Final mlp Linear(feature_size, ans_vocab).  (Output is a single 16-wide
    # vreg write; padding to a 128-lane slab only pays off in a serving loop.)
    out_ref[...] = (jnp.dot(fused, w_mlp_ref[...], preferred_element_type=jnp.float32)
                    + b_mlp_ref[...])                                # (B, ans_vocab)


# ------------------------------- wrapper ---------------------------------------
def _vqa_forward_impl(p, image, question):
    img_flat = image.reshape(image.shape[0], -1)                     # NCHW -> (B, C*H*W)
    # Embedding lookup (gather) is glue, done in plain JAX; laid out t-major so
    # the kernel's per-timestep slices are cheap leading-dim slices.
    emb2d = p["embed"][question.swapaxes(0, 1)].reshape(-1, QST_EMBED)  # (T*B, E)
    return pl.pallas_call(
        vqa_fused_kernel,
        out_shape=jax.ShapeDtypeStruct((image.shape[0], ANS_VOCAB), jnp.float32),
        in_specs=[_VMEM] * 14,
        out_specs=_VMEM,
    )(img_flat, emb2d,
      p["img_backbone_w"], p["img_fc_w"], p["img_fc_b"],
      p["lstm_w_ih"], p["lstm_w_hh"], p["lstm_b"],
      p["qst_fc_w"], p["qst_fc_b"],
      p["mutan_w"], p["mutan_b"],
      p["mlp_w"], p["mlp_b"])


vqa_forward = jax.jit(_vqa_forward_impl)


# ------------------------------- parameters ------------------------------------
def _linear(key, fan_in, fan_out):
    k1, k2 = jax.random.split(key)
    lim = 1.0 / jnp.sqrt(jnp.float32(fan_in))
    w = jax.random.uniform(k1, (fan_in, fan_out), jnp.float32, -lim, lim)
    b = jax.random.uniform(k2, (1, fan_out), jnp.float32, -lim, lim)
    return w, b


def init_params(key):
    keys = iter(jax.random.split(key, 64))
    p = {}
    # ImgEncoder
    p["img_backbone_w"], _ = _linear(next(keys), IMG_C * IMG_H * IMG_W, BACKBONE_FEATS)
    p["img_fc_w"], p["img_fc_b"] = _linear(next(keys), BACKBONE_FEATS, FEATURE_SIZE)
    # QstEncoder
    p["embed"] = jax.random.normal(next(keys), (QST_VOCAB, QST_EMBED), jnp.float32)
    w_ih_l, w_hh_l, b_l = [], [], []
    for l in range(NUM_LSTM_LAYERS):
        in_dim = QST_EMBED if l == 0 else HIDDEN                     # equal here -> stackable
        wi, bi = _linear(next(keys), in_dim, 4 * HIDDEN)
        wh, bh = _linear(next(keys), HIDDEN, 4 * HIDDEN)
        w_ih_l.append(wi); w_hh_l.append(wh); b_l.append(bi + bh)    # combined bias
    p["lstm_w_ih"] = jnp.stack(w_ih_l)                               # (L, in, 4H)
    p["lstm_w_hh"] = jnp.stack(w_hh_l)                               # (L, H, 4H)
    p["lstm_b"] = jnp.stack(b_l)                                     # (L, 1, 4H)
    p["qst_fc_w"], p["qst_fc_b"] = _linear(
        next(keys), 2 * NUM_LSTM_LAYERS * HIDDEN, FEATURE_SIZE)
    # MutanFusion: 5 image + 5 question Linear(F, F) layers, concatenated along
    # the output axis into one (F, 5F) weight per modality (lane-dense matmul).
    wv, bv, wq, bq = [], [], [], []
    for _ in range(MUTAN_LAYERS):
        w, b = _linear(next(keys), FEATURE_SIZE, FEATURE_SIZE); wv.append(w); bv.append(b)
        w, b = _linear(next(keys), FEATURE_SIZE, FEATURE_SIZE); wq.append(w); bq.append(b)
    p["mutan_w"] = jnp.stack([jnp.concatenate(wv, axis=1),
                              jnp.concatenate(wq, axis=1)])          # (2, F, 5F)
    p["mutan_b"] = jnp.stack([jnp.concatenate(bv, axis=1),
                              jnp.concatenate(bq, axis=1)])          # (2, 1, 5F)
    # final mlp: Linear(feature_size, ans_vocab_size)
    p["mlp_w"], p["mlp_b"] = _linear(next(keys), FEATURE_SIZE, ANS_VOCAB)
    # NOTE: VqaModel.fc1/fc2/dropout are defined but unused in forward(); omitted.
    return p


# --------------------------------- main -----------------------------------------
if __name__ == "__main__":
    key = jax.random.PRNGKey(0)
    k_param, k_img, k_qst = jax.random.split(key, 3)

    params = init_params(k_param)
    image = jax.random.normal(k_img, (B, IMG_C, IMG_H, IMG_W), jnp.float32)   # NCHW
    question = jax.random.randint(k_qst, (B, SEQ), 0, QST_VOCAB, jnp.int32)

    out = vqa_forward(params, image, question)
    jax.block_until_ready(out)
    assert out.shape == (B, ANS_VOCAB) and out.dtype == jnp.float32
    assert bool(jnp.all(jnp.isfinite(out)))
    print("KERNEL_OK")
</pallas_src>

<mosaic_0001>
module attributes {stable_mosaic.version = 11 : i64} {
  func.func @vqa_fused_kernel(%arg0: memref<8x192xf32, #tpu.memory_space<vmem>>, %arg1: memref<64x16xf32, #tpu.memory_space<vmem>>, %arg2: memref<192x64xf32, #tpu.memory_space<vmem>>, %arg3: memref<64x32xf32, #tpu.memory_space<vmem>>, %arg4: memref<1x32xf32, #tpu.memory_space<vmem>>, %arg5: memref<2x16x64xf32, #tpu.memory_space<vmem>>, %arg6: memref<2x16x64xf32, #tpu.memory_space<vmem>>, %arg7: memref<2x1x64xf32, #tpu.memory_space<vmem>>, %arg8: memref<64x32xf32, #tpu.memory_space<vmem>>, %arg9: memref<1x32xf32, #tpu.memory_space<vmem>>, %arg10: memref<2x32x160xf32, #tpu.memory_space<vmem>>, %arg11: memref<2x1x160xf32, #tpu.memory_space<vmem>>, %arg12: memref<32x16xf32, #tpu.memory_space<vmem>>, %arg13: memref<1x16xf32, #tpu.memory_space<vmem>>, %arg14: memref<8x16xf32, #tpu.memory_space<vmem>>) attributes {dimension_semantics = [], scalar_prefetch = 0 : i64, scratch_operands = 0 : i64, tpu.core_type = #tpu.core_type<tc>} {
    %c0 = arith.constant 0 : index
    %c0_0 = arith.constant 0 : index
    %0 = vector.load %arg0[%c0, %c0_0] : memref<8x192xf32, #tpu.memory_space<vmem>>, vector<8x192xf32>
    %c0_1 = arith.constant 0 : index
    %c0_2 = arith.constant 0 : index
    %1 = vector.load %arg2[%c0_1, %c0_2] : memref<192x64xf32, #tpu.memory_space<vmem>>, vector<192x64xf32>
    %cst = arith.constant dense<0.000000e+00> : vector<8x64xf32>
    %2 = tpu.matmul %0, %1, %cst {dimension_numbers = #tpu.dot_dimension_numbers<[1], [0], [0], [1], [0, 0, 1, 1], [], []>} : vector<8x192xf32>, vector<192x64xf32>, vector<8x64xf32> -> vector<8x64xf32>
    %cst_3 = arith.constant 0.000000e+00 : f32
    %3 = vector.broadcast %cst_3 : f32 to vector<8x64xf32>
    %4 = arith.maximumf %2, %3 : vector<8x64xf32>
    %c0_4 = arith.constant 0 : index
    %c0_5 = arith.constant 0 : index
    %5 = vector.load %arg3[%c0_4, %c0_5] : memref<64x32xf32, #tpu.memory_space<vmem>>, vector<64x32xf32>
    %cst_6 = arith.constant dense<0.000000e+00> : vector<8x32xf32>
    %6 = tpu.matmul %4, %5, %cst_6 {dimension_numbers = #tpu.dot_dimension_numbers<[1], [0], [0], [1], [0, 0, 1, 1], [], []>} : vector<8x64xf32>, vector<64x32xf32>, vector<8x32xf32> -> vector<8x32xf32>
    %c0_7 = arith.constant 0 : index
    %c0_8 = arith.constant 0 : index
    %7 = vector.load %arg4[%c0_7, %c0_8] : memref<1x32xf32, #tpu.memory_space<vmem>>, vector<1x32xf32>
    %8 = vector.broadcast %7 : vector<1x32xf32> to vector<8x32xf32>
    %9 = arith.addf %6, %8 : vector<8x32xf32>
    %10 = arith.mulf %9, %9 : vector<8x32xf32>
    %cst_9 = arith.constant dense<0.000000e+00> : vector<8xf32>
    %11 = vector.multi_reduction <add>, %10, %cst_9 [1] : vector<8x32xf32> to vector<8xf32>
    %12 = vector.shape_cast %11 : vector<8xf32> to vector<8x1xf32>
    %13 = math.rsqrt %12 : vector<8x1xf32>
    %14 = vector.broadcast %13 : vector<8x1xf32> to vector<8x32xf32>
    %15 = arith.mulf %9, %14 : vector<8x32xf32>
    %c0_10 = arith.constant 0 : index
    %c0_11 = arith.constant 0 : index
    %16 = vector.load %arg1[%c0_10, %c0_11] : memref<64x16xf32, #tpu.memory_space<vmem>>, vector<64x16xf32>
    %17 = math.tanh %16 : vector<64x16xf32>
    %c0_12 = arith.constant 0 : index
    %c0_13 = arith.constant 0 : index
    %c0_14 = arith.constant 0 : index
    %18 = vector.load %arg5[%c0_12, %c0_13, %c0_14] : memref<2x16x64xf32, #tpu.memory_space<vmem>>, vector<1x16x64xf32>
    %19 = vector.shape_cast %18 : vector<1x16x64xf32> to vector<16x64xf32>
    %c0_15 = arith.constant 0 : index
    %c0_16 = arith.constant 0 : index
    %c0_17 = arith.constant 0 : index
    %20 = vector.load %arg6[%c0_15, %c0_16, %c0_17] : memref<2x16x64xf32, #tpu.memory_space<vmem>>, vector<1x16x64xf32>
    %21 = vector.shape_cast %20 : vector<1x16x64xf32> to vector<16x64xf32>
    %c0_18 = arith.constant 0 : index
    %c0_19 = arith.constant 0 : index
    %c0_20 = arith.constant 0 : index
    %22 = vector.load %arg7[%c0_18, %c0_19, %c0_20] : memref<2x1x64xf32, #tpu.memory_space<vmem>>, vector<1x1x64xf32>
    %23 = vector.shape_cast %22 : vector<1x1x64xf32> to vector<1x64xf32>
    %cst_21 = arith.constant dense<0.000000e+00> : vector<64x64xf32>
    %24 = tpu.matmul %17, %19, %cst_21 {dimension_numbers = #tpu.dot_dimension_numbers<[1], [0], [0], [1], [0, 0, 1, 1], [], []>} : vector<64x16xf32>, vector<16x64xf32>, vector<64x64xf32> -> vector<64x64xf32>
    %25 = vector.broadcast %23 : vector<1x64xf32> to vector<64x64xf32>
    %26 = arith.addf %24, %25 : vector<64x64xf32>
    %cst_22 = arith.constant 0.000000e+00 : f32
    %27 = vector.broadcast %cst_22 : f32 to vector<8x16xf32>
    %cst_23 = arith.constant 0.000000e+00 : f32
    %28 = vector.broadcast %cst_23 : f32 to vector<8x16xf32>
    %29 = vector.extract_strided_slice %26 {offsets = [0, 0], sizes = [8, 64], strides = [1, 1]} : vector<64x64xf32> to vector<8x64xf32>
    %cst_24 = arith.constant dense<0.000000e+00> : vector<8x64xf32>
    %30 = tpu.matmul %27, %21, %cst_24 {dimension_numbers = #tpu.dot_dimension_numbers<[1], [0], [0], [1], [0, 0, 1, 1], [], []>} : vector<8x16xf32>, vector<16x64xf32>, vector<8x64xf32> -> vector<8x64xf32>
    %31 = arith.addf %29, %30 : vector<8x64xf32>
    %32 = vector.extract_strided_slice %31 {offsets = [0, 0], sizes = [8, 16], strides = [1, 1]} : vector<8x64xf32> to vector<8x16xf32>
    %33 = arith.negf %32 : vector<8x16xf32>
    %34 = math.exp %33 : vector<8x16xf32>
    %cst_25 = arith.constant 1.000000e+00 : f32
    %35 = vector.broadcast %cst_25 : f32 to vector<8x16xf32>
    %36 = arith.addf %35, %34 : vector<8x16xf32>
    %37 = arith.divf %35, %36 : vector<8x16xf32>
    %38 = vector.extract_strided_slice %31 {offsets = [0, 16], sizes = [8, 16], strides = [1, 1]} : vector<8x64xf32> to vector<8x16xf32>
    %39 = arith.negf %38 : vector<8x16xf32>
    %40 = math.exp %39 : vector<8x16xf32>
    %cst_26 = arith.constant 1.000000e+00 : f32
    %41 = vector.broadcast %cst_26 : f32 to vector<8x16xf32>
    %42 = arith.addf %41, %40 : vector<8x16xf32>
    %43 = arith.divf %41, %42 : vector<8x16xf32>
    %44 = vector.extract_strided_slice %31 {offsets = [0, 32], sizes = [8, 16], strides = [1, 1]} : vector<8x64xf32> to vector<8x16xf32>
    %45 = math.tanh %44 : vector<8x16xf32>
    %46 = vector.extract_strided_slice %31 {offsets = [0, 48], sizes = [8, 16], strides = [1, 1]} : vector<8x64xf32> to vector<8x16xf32>
    %47 = arith.negf %46 : vector<8x16xf32>
    %48 = math.exp %47 : vector<8x16xf32>
    %cst_27 = arith.constant 1.000000e+00 : f32
    %49 = vector.broadcast %cst_27 : f32 to vector<8x16xf32>
    %50 = arith.addf %49, %48 : vector<8x16xf32>
    %51 = arith.divf %49, %50 : vector<8x16xf32>
    %52 = arith.mulf %43, %28 : vector<8x16xf32>
    %53 = arith.mulf %37, %45 : vector<8x16xf32>
    %54 = arith.addf %52, %53 : vector<8x16xf32>
    %55 = math.tanh %54 : vector<8x16xf32>
    %56 = arith.mulf %51, %55 : vector<8x16xf32>
    %57 = vector.extract_strided_slice %26 {offsets = [8, 0], sizes = [8, 64], strides = [1, 1]} : vector<64x64xf32> to vector<8x64xf32>
    %cst_28 = arith.constant dense<0.000000e+00> : vector<8x64xf32>
    %58 = tpu.matmul %56, %21, %cst_28 {dimension_numbers = #tpu.dot_dimension_numbers<[1], [0], [0], [1], [0, 0, 1, 1], [], []>} : vector<8x16xf32>, vector<16x64xf32>, vector<8x64xf32> -> vector<8x64xf32>
    %59 = arith.addf %57, %58 : vector<8x64xf32>
    %60 = vector.extract_strided_slice %59 {offsets = [0, 0], sizes = [8, 16], strides = [1, 1]} : vector<8x64xf32> to vector<8x16xf32>
    %61 = arith.negf %60 : vector<8x16xf32>
    %62 = math.exp %61 : vector<8x16xf32>
    %cst_29 = arith.constant 1.000000e+00 : f32
    %63 = vector.broadcast %cst_29 : f32 to vector<8x16xf32>
    %64 = arith.addf %63, %62 : vector<8x16xf32>
    %65 = arith.divf %63, %64 : vector<8x16xf32>
    %66 = vector.extract_strided_slice %59 {offsets = [0, 16], sizes = [8, 16], strides = [1, 1]} : vector<8x64xf32> to vector<8x16xf32>
    %67 = arith.negf %66 : vector<8x16xf32>
    %68 = math.exp %67 : vector<8x16xf32>
    %cst_30 = arith.constant 1.000000e+00 : f32
    %69 = vector.broadcast %cst_30 : f32 to vector<8x16xf32>
    %70 = arith.addf %69, %68 : vector<8x16xf32>
    %71 = arith.divf %69, %70 : vector<8x16xf32>
    %72 = vector.extract_strided_slice %59 {offsets = [0, 32], sizes = [8, 16], strides = [1, 1]} : vector<8x64xf32> to vector<8x16xf32>
    %73 = math.tanh %72 : vector<8x16xf32>
    %74 = vector.extract_strided_slice %59 {offsets = [0, 48], sizes = [8, 16], strides = [1, 1]} : vector<8x64xf32> to vector<8x16xf32>
    %75 = arith.negf %74 : vector<8x16xf32>
    %76 = math.exp %75 : vector<8x16xf32>
    %cst_31 = arith.constant 1.000000e+00 : f32
    %77 = vector.broadcast %cst_31 : f32 to vector<8x16xf32>
    %78 = arith.addf %77, %76 : vector<8x16xf32>
    %79 = arith.divf %77, %78 : vector<8x16xf32>
    %80 = arith.mulf %71, %54 : vector<8x16xf32>
    %81 = arith.mulf %65, %73 : vector<8x16xf32>
    %82 = arith.addf %80, %81 : vector<8x16xf32>
    %83 = math.tanh %82 : vector<8x16xf32>
    %84 = arith.mulf %79, %83 : vector<8x16xf32>
    %85 = vector.extract_strided_slice %26 {offsets = [16, 0], sizes = [8, 64], strides = [1, 1]} : vector<64x64xf32> to vector<8x64xf32>
    %cst_32 = arith.constant dense<0.000000e+00> : vector<8x64xf32>
    %86 = tpu.matmul %84, %21, %cst_32 {dimension_numbers = #tpu.dot_dimension_numbers<[1], [0], [0], [1], [0, 0, 1, 1], [], []>} : vector<8x16xf32>, vector<16x64xf32>, vector<8x64xf32> -> vector<8x64xf32>
    %87 = arith.addf %85, %86 : vector<8x64xf32>
    %88 = vector.extract_strided_slice %87 {offsets = [0, 0], sizes = [8, 16], strides = [1, 1]} : vector<8x64xf32> to vector<8x16xf32>
    %89 = arith.negf %88 : vector<8x16xf32>
    %90 = math.exp %89 : vector<8x16xf32>
    %cst_33 = arith.constant 1.000000e+00 : f32
    %91 = vector.broadcast %cst_33 : f32 to vector<8x16xf32>
    %92 = arith.addf %91, %90 : vector<8x16xf32>
    %93 = arith.divf %91, %92 : vector<8x16xf32>
    %94 = vector.extract_strided_slice %87 {offsets = [0, 16], sizes = [8, 16], strides = [1, 1]} : vector<8x64xf32> to vector<8x16xf32>
    %95 = arith.negf %94 : vector<8x16xf32>
    %96 = math.exp %95 : vector<8x16xf32>
    %cst_34 = arith.constant 1.000000e+00 : f32
    %97 = vector.broadcast %cst_34 : f32 to vector<8x16xf32>
    %98 = arith.addf %97, %96 : vector<8x16xf32>
    %99 = arith.divf %97, %98 : vector<8x16xf32>
    %100 = vector.extract_strided_slice %87 {offsets = [0, 32], sizes = [8, 16], strides = [1, 1]} : vector<8x64xf32> to vector<8x16xf32>
    %101 = math.tanh %100 : vector<8x16xf32>
    %102 = vector.extract_strided_slice %87 {offsets = [0, 48], sizes = [8, 16], strides = [1, 1]} : vector<8x64xf32> to vector<8x16xf32>
    %103 = arith.negf %102 : vector<8x16xf32>
    %104 = math.exp %103 : vector<8x16xf32>
    %cst_35 = arith.constant 1.000000e+00 : f32
    %105 = vector.broadcast %cst_35 : f32 to vector<8x16xf32>
    %106 = arith.addf %105, %104 : vector<8x16xf32>
    %107 = arith.divf %105, %106 : vector<8x16xf32>
    %108 = arith.mulf %99, %82 : vector<8x16xf32>
    %109 = arith.mulf %93, %101 : vector<8x16xf32>
    %110 = arith.addf %108, %109 : vector<8x16xf32>
    %111 = math.tanh %110 : vector<8x16xf32>
    %112 = arith.mulf %107, %111 : vector<8x16xf32>
    %113 = vector.extract_strided_slice %26 {offsets = [24, 0], sizes = [8, 64], strides = [1, 1]} : vector<64x64xf32> to vector<8x64xf32>
    %cst_36 = arith.constant dense<0.000000e+00> : vector<8x64xf32>
    %114 = tpu.matmul %112, %21, %cst_36 {dimension_numbers = #tpu.dot_dimension_numbers<[1], [0], [0], [1], [0, 0, 1, 1], [], []>} : vector<8x16xf32>, vector<16x64xf32>, vector<8x64xf32> -> vector<8x64xf32>
    %115 = arith.addf %113, %114 : vector<8x64xf32>
    %116 = vector.extract_strided_slice %115 {offsets = [0, 0], sizes = [8, 16], strides = [1, 1]} : vector<8x64xf32> to vector<8x16xf32>
    %117 = arith.negf %116 : vector<8x16xf32>
    %118 = math.exp %117 : vector<8x16xf32>
    %cst_37 = arith.constant 1.000000e+00 : f32
    %119 = vector.broadcast %cst_37 : f32 to vector<8x16xf32>
    %120 = arith.addf %119, %118 : vector<8x16xf32>
    %121 = arith.divf %119, %120 : vector<8x16xf32>
    %122 = vector.extract_strided_slice %115 {offsets = [0, 16], sizes = [8, 16], strides = [1, 1]} : vector<8x64xf32> to vector<8x16xf32>
    %123 = arith.negf %122 : vector<8x16xf32>
    %124 = math.exp %123 : vector<8x16xf32>
    %cst_38 = arith.constant 1.000000e+00 : f32
    %125 = vector.broadcast %cst_38 : f32 to vector<8x16xf32>
    %126 = arith.addf %125, %124 : vector<8x16xf32>
    %127 = arith.divf %125, %126 : vector<8x16xf32>
    %128 = vector.extract_strided_slice %115 {offsets = [0, 32], sizes = [8, 16], strides = [1, 1]} : vector<8x64xf32> to vector<8x16xf32>
    %129 = math.tanh %128 : vector<8x16xf32>
    %130 = vector.extract_strided_slice %115 {offsets = [0, 48], sizes = [8, 16], strides = [1, 1]} : vector<8x64xf32> to vector<8x16xf32>
    %131 = arith.negf %130 : vector<8x16xf32>
    %132 = math.exp %131 : vector<8x16xf32>
    %cst_39 = arith.constant 1.000000e+00 : f32
    %133 = vector.broadcast %cst_39 : f32 to vector<8x16xf32>
    %134 = arith.addf %133, %132 : vector<8x16xf32>
    %135 = arith.divf %133, %134 : vector<8x16xf32>
    %136 = arith.mulf %127, %110 : vector<8x16xf32>
    %137 = arith.mulf %121, %129 : vector<8x16xf32>
    %138 = arith.addf %136, %137 : vector<8x16xf32>
    %139 = math.tanh %138 : vector<8x16xf32>
    %140 = arith.mulf %135, %139 : vector<8x16xf32>
    %141 = vector.extract_strided_slice %26 {offsets = [32, 0], sizes = [8, 64], strides = [1, 1]} : vector<64x64xf32> to vector<8x64xf32>
    %cst_40 = arith.constant dense<0.000000e+00> : vector<8x64xf32>
    %142 = tpu.matmul %140, %21, %cst_40 {dimension_numbers = #tpu.dot_dimension_numbers<[1], [0], [0], [1], [0, 0, 1, 1], [], []>} : vector<8x16xf32>, vector<16x64xf32>, vector<8x64xf32> -> vector<8x64xf32>
    %143 = arith.addf %141, %142 : vector<8x64xf32>
    %144 = vector.extract_strided_slice %143 {offsets = [0, 0], sizes = [8, 16], strides = [1, 1]} : vector<8x64xf32> to vector<8x16xf32>
    %145 = arith.negf %144 : vector<8x16xf32>
    %146 = math.exp %145 : vector<8x16xf32>
    %cst_41 = arith.constant 1.000000e+00 : f32
    %147 = vector.broadcast %cst_41 : f32 to vector<8x16xf32>
    %148 = arith.addf %147, %146 : vector<8x16xf32>
    %149 = arith.divf %147, %148 : vector<8x16xf32>
    %150 = vector.extract_strided_slice %143 {offsets = [0, 16], sizes = [8, 16], strides = [1, 1]} : vector<8x64xf32> to vector<8x16xf32>
    %151 = arith.negf %150 : vector<8x16xf32>
    %152 = math.exp %151 : vector<8x16xf32>
    %cst_42 = arith.constant 1.000000e+00 : f32
    %153 = vector.broadcast %cst_42 : f32 to vector<8x16xf32>
    %154 = arith.addf %153, %152 : vector<8x16xf32>
    %155 = arith.divf %153, %154 : vector<8x16xf32>
    %156 = vector.extract_strided_slice %143 {offsets = [0, 32], sizes = [8, 16], strides = [1, 1]} : vector<8x64xf32> to vector<8x16xf32>
    %157 = math.tanh %156 : vector<8x16xf32>
    %158 = vector.extract_strided_slice %143 {offsets = [0, 48], sizes = [8, 16], strides = [1, 1]} : vector<8x64xf32> to vector<8x16xf32>
    %159 = arith.negf %158 : vector<8x16xf32>
    %160 = math.exp %159 : vector<8x16xf32>
    %cst_43 = arith.constant 1.000000e+00 : f32
    %161 = vector.broadcast %cst_43 : f32 to vector<8x16xf32>
    %162 = arith.addf %161, %160 : vector<8x16xf32>
    %163 = arith.divf %161, %162 : vector<8x16xf32>
    %164 = arith.mulf %155, %138 : vector<8x16xf32>
    %165 = arith.mulf %149, %157 : vector<8x16xf32>
    %166 = arith.addf %164, %165 : vector<8x16xf32>
    %167 = math.tanh %166 : vector<8x16xf32>
    %168 = arith.mulf %163, %167 : vector<8x16xf32>
    %169 = vector.extract_strided_slice %26 {offsets = [40, 0], sizes = [8, 64], strides = [1, 1]} : vector<64x64xf32> to vector<8x64xf32>
    %cst_44 = arith.constant dense<0.000000e+00> : vector<8x64xf32>
    %170 = tpu.matmul %168, %21, %cst_44 {dimension_numbers = #tpu.dot_dimension_numbers<[1], [0], [0], [1], [0, 0, 1, 1], [], []>} : vector<8x16xf32>, vector<16x64xf32>, vector<8x64xf32> -> vector<8x64xf32>
    %171 = arith.addf %169, %170 : vector<8x64xf32>
    %172 = vector.extract_strided_slice %171 {offsets = [0, 0], sizes = [8, 16], strides = [1, 1]} : vector<8x64xf32> to vector<8x16xf32>
    %173 = arith.negf %172 : vector<8x16xf32>
    %174 = math.exp %173 : vector<8x16xf32>
    %cst_45 = arith.constant 1.000000e+00 : f32
    %175 = vector.broadcast %cst_45 : f32 to vector<8x16xf32>
    %176 = arith.addf %175, %174 : vector<8x16xf32>
    %177 = arith.divf %175, %176 : vector<8x16xf32>
    %178 = vector.extract_strided_slice %171 {offsets = [0, 16], sizes = [8, 16], strides = [1, 1]} : vector<8x64xf32> to vector<8x16xf32>
    %179 = arith.negf %178 : vector<8x16xf32>
    %180 = math.exp %179 : vector<8x16xf32>
    %cst_46 = arith.constant 1.000000e+00 : f32
    %181 = vector.broadcast %cst_46 : f32 to vector<8x16xf32>
    %182 = arith.addf %181, %180 : vector<8x16xf32>
    %183 = arith.divf %181, %182 : vector<8x16xf32>
    %184 = vector.extract_strided_slice %171 {offsets = [0, 32], sizes = [8, 16], strides = [1, 1]} : vector<8x64xf32> to vector<8x16xf32>
    %185 = math.tanh %184 : vector<8x16xf32>
    %186 = vector.extract_strided_slice %171 {offsets = [0, 48], sizes = [8, 16], strides = [1, 1]} : vector<8x64xf32> to vector<8x16xf32>
    %187 = arith.negf %186 : vector<8x16xf32>
    %188 = math.exp %187 : vector<8x16xf32>
    %cst_47 = arith.constant 1.000000e+00 : f32
    %189 = vector.broadcast %cst_47 : f32 to vector<8x16xf32>
    %190 = arith.addf %189, %188 : vector<8x16xf32>
    %191 = arith.divf %189, %190 : vector<8x16xf32>
    %192 = arith.mulf %183, %166 : vector<8x16xf32>
    %193 = arith.mulf %177, %185 : vector<8x16xf32>
    %194 = arith.addf %192, %193 : vector<8x16xf32>
    %195 = math.tanh %194 : vector<8x16xf32>
    %196 = arith.mulf %191, %195 : vector<8x16xf32>
    %197 = vector.extract_strided_slice %26 {offsets = [48, 0], sizes = [8, 64], strides = [1, 1]} : vector<64x64xf32> to vector<8x64xf32>
    %cst_48 = arith.constant dense<0.000000e+00> : vector<8x64xf32>
    %198 = tpu.matmul %196, %21, %cst_48 {dimension_numbers = #tpu.dot_dimension_numbers<[1], [0], [0], [1], [0, 0, 1, 1], [], []>} : vector<8x16xf32>, vector<16x64xf32>, vector<8x64xf32> -> vector<8x64xf32>
    %199 = arith.addf %197, %198 : vector<8x64xf32>
    %200 = vector.extract_strided_slice %199 {offsets = [0, 0], sizes = [8, 16], strides = [1, 1]} : vector<8x64xf32> to vector<8x16xf32>
    %201 = arith.negf %200 : vector<8x16xf32>
    %202 = math.exp %201 : vector<8x16xf32>
    %cst_49 = arith.constant 1.000000e+00 : f32
    %203 = vector.broadcast %cst_49 : f32 to vector<8x16xf32>
    %204 = arith.addf %203, %202 : vector<8x16xf32>
    %205 = arith.divf %203, %204 : vector<8x16xf32>
    %206 = vector.extract_strided_slice %199 {offsets = [0, 16], sizes = [8, 16], strides = [1, 1]} : vector<8x64xf32> to vector<8x16xf32>
    %207 = arith.negf %206 : vector<8x16xf32>
    %208 = math.exp %207 : vector<8x16xf32>
    %cst_50 = arith.constant 1.000000e+00 : f32
    %209 = vector.broadcast %cst_50 : f32 to vector<8x16xf32>
    %210 = arith.addf %209, %208 : vector<8x16xf32>
    %211 = arith.divf %209, %210 : vector<8x16xf32>
    %212 = vector.extract_strided_slice %199 {offsets = [0, 32], sizes = [8, 16], strides = [1, 1]} : vector<8x64xf32> to vector<8x16xf32>
    %213 = math.tanh %212 : vector<8x16xf32>
    %214 = vector.extract_strided_slice %199 {offsets = [0, 48], sizes = [8, 16], strides = [1, 1]} : vector<8x64xf32> to vector<8x16xf32>
    %215 = arith.negf %214 : vector<8x16xf32>
    %216 = math.exp %215 : vector<8x16xf32>
    %cst_51 = arith.constant 1.000000e+00 : f32
    %217 = vector.broadcast %cst_51 : f32 to vector<8x16xf32>
    %218 = arith.addf %217, %216 : vector<8x16xf32>
    %219 = arith.divf %217, %218 : vector<8x16xf32>
    %220 = arith.mulf %211, %194 : vector<8x16xf32>
    %221 = arith.mulf %205, %213 : vector<8x16xf32>
    %222 = arith.addf %220, %221 : vector<8x16xf32>
    %223 = math.tanh %222 : vector<8x16xf32>
    %224 = arith.mulf %219, %223 : vector<8x16xf32>
    %225 = vector.extract_strided_slice %26 {offsets = [56, 0], sizes = [8, 64], strides = [1, 1]} : vector<64x64xf32> to vector<8x64xf32>
    %cst_52 = arith.constant dense<0.000000e+00> : vector<8x64xf32>
    %226 = tpu.matmul %224, %21, %cst_52 {dimension_numbers = #tpu.dot_dimension_numbers<[1], [0], [0], [1], [0, 0, 1, 1], [], []>} : vector<8x16xf32>, vector<16x64xf32>, vector<8x64xf32> -> vector<8x64xf32>
    %227 = arith.addf %225, %226 : vector<8x64xf32>
    %228 = vector.extract_strided_slice %227 {offsets = [0, 0], sizes = [8, 16], strides = [1, 1]} : vector<8x64xf32> to vector<8x16xf32>
    %229 = arith.negf %228 : vector<8x16xf32>
    %230 = math.exp %229 : vector<8x16xf32>
    %cst_53 = arith.constant 1.000000e+00 : f32
    %231 = vector.broadcast %cst_53 : f32 to vector<8x16xf32>
    %232 = arith.addf %231, %230 : vector<8x16xf32>
    %233 = arith.divf %231, %232 : vector<8x16xf32>
    %234 = vector.extract_strided_slice %227 {offsets = [0, 16], sizes = [8, 16], strides = [1, 1]} : vector<8x64xf32> to vector<8x16xf32>
    %235 = arith.negf %234 : vector<8x16xf32>
    %236 = math.exp %235 : vector<8x16xf32>
    %cst_54 = arith.constant 1.000000e+00 : f32
    %237 = vector.broadcast %cst_54 : f32 to vector<8x16xf32>
    %238 = arith.addf %237, %236 : vector<8x16xf32>
    %239 = arith.divf %237, %238 : vector<8x16xf32>
    %240 = vector.extract_strided_slice %227 {offsets = [0, 32], sizes = [8, 16], strides = [1, 1]} : vector<8x64xf32> to vector<8x16xf32>
    %241 = math.tanh %240 : vector<8x16xf32>
    %242 = vector.extract_strided_slice %227 {offsets = [0, 48], sizes = [8, 16], strides = [1, 1]} : vector<8x64xf32> to vector<8x16xf32>
    %243 = arith.negf %242 : vector<8x16xf32>
    %244 = math.exp %243 : vector<8x16xf32>
    %cst_55 = arith.constant 1.000000e+00 : f32
    %245 = vector.broadcast %cst_55 : f32 to vector<8x16xf32>
    %246 = arith.addf %245, %244 : vector<8x16xf32>
    %247 = arith.divf %245, %246 : vector<8x16xf32>
    %248 = arith.mulf %239, %222 : vector<8x16xf32>
    %249 = arith.mulf %233, %241 : vector<8x16xf32>
    %250 = arith.addf %248, %249 : vector<8x16xf32>
    %251 = math.tanh %250 : vector<8x16xf32>
    %252 = arith.mulf %247, %251 : vector<8x16xf32>
    %253 = tpu.concatenate %56, %84, %112, %140, %168, %196, %224, %252 in 0 : vector<8x16xf32>, vector<8x16xf32>, vector<8x16xf32>, vector<8x16xf32>, vector<8x16xf32>, vector<8x16xf32>, vector<8x16xf32>, vector<8x16xf32> -> vector<64x16xf32>
    %c1 = arith.constant 1 : index
    %c0_56 = arith.constant 0 : index
    %c0_57 = arith.constant 0 : index
    %254 = vector.load %arg5[%c1, %c0_56, %c0_57] : memref<2x16x64xf32, #tpu.memory_space<vmem>>, vector<1x16x64xf32>
    %255 = vector.shape_cast %254 : vector<1x16x64xf32> to vector<16x64xf32>
    %c1_58 = arith.constant 1 : index
    %c0_59 = arith.constant 0 : index
    %c0_60 = arith.constant 0 : index
    %256 = vector.load %arg6[%c1_58, %c0_59, %c0_60] : memref<2x16x64xf32, #tpu.memory_space<vmem>>, vector<1x16x64xf32>
    %257 = vector.shape_cast %256 : vector<1x16x64xf32> to vector<16x64xf32>
    %c1_61 = arith.constant 1 : index
    %c0_62 = arith.constant 0 : index
    %c0_63 = arith.constant 0 : index
    %258 = vector.load %arg7[%c1_61, %c0_62, %c0_63] : memref<2x1x64xf32, #tpu.memory_space<vmem>>, vector<1x1x64xf32>
    %259 = vector.shape_cast %258 : vector<1x1x64xf32> to vector<1x64xf32>
    %cst_64 = arith.constant dense<0.000000e+00> : vector<64x64xf32>
    %260 = tpu.matmul %253, %255, %cst_64 {dimension_numbers = #tpu.dot_dimension_numbers<[1], [0], [0], [1], [0, 0, 1, 1], [], []>} : vector<64x16xf32>, vector<16x64xf32>, vector<64x64xf32> -> vector<64x64xf32>
    %261 = vector.broadcast %259 : vector<1x64xf32> to vector<64x64xf32>
    %262 = arith.addf %260, %261 : vector<64x64xf32>
    %cst_65 = arith.constant 0.000000e+00 : f32
    %263 = vector.broadcast %cst_65 : f32 to vector<8x16xf32>
    %cst_66 = arith.constant 0.000000e+00 : f32
    %264 = vector.broadcast %cst_66 : f32 to vector<8x16xf32>
    %265 = vector.extract_strided_slice %262 {offsets = [0, 0], sizes = [8, 64], strides = [1, 1]} : vector<64x64xf32> to vector<8x64xf32>
    %cst_67 = arith.constant dense<0.000000e+00> : vector<8x64xf32>
    %266 = tpu.matmul %263, %257, %cst_67 {dimension_numbers = #tpu.dot_dimension_numbers<[1], [0], [0], [1], [0, 0, 1, 1], [], []>} : vector<8x16xf32>, vector<16x64xf32>, vector<8x64xf32> -> vector<8x64xf32>
    %267 = arith.addf %265, %266 : vector<8x64xf32>
    %268 = vector.extract_strided_slice %267 {offsets = [0, 0], sizes = [8, 16], strides = [1, 1]} : vector<8x64xf32> to vector<8x16xf32>
    %269 = arith.negf %268 : vector<8x16xf32>
    %270 = math.exp %269 : vector<8x16xf32>
    %cst_68 = arith.constant 1.000000e+00 : f32
    %271 = vector.broadcast %cst_68 : f32 to vector<8x16xf32>
    %272 = arith.addf %271, %270 : vector<8x16xf32>
    %273 = arith.divf %271, %272 : vector<8x16xf32>
    %274 = vector.extract_strided_slice %267 {offsets = [0, 16], sizes = [8, 16], strides = [1, 1]} : vector<8x64xf32> to vector<8x16xf32>
    %275 = arith.negf %274 : vector<8x16xf32>
    %276 = math.exp %275 : vector<8x16xf32>
    %cst_69 = arith.constant 1.000000e+00 : f32
    %277 = vector.broadcast %cst_69 : f32 to vector<8x16xf32>
    %278 = arith.addf %277, %276 : vector<8x16xf32>
    %279 = arith.divf %277, %278 : vector<8x16xf32>
    %280 = vector.extract_strided_slice %267 {offsets = [0, 32], sizes = [8, 16], strides = [1, 1]} : vector<8x64xf32> to vector<8x16xf32>
    %281 = math.tanh %280 : vector<8x16xf32>
    %282 = vector.extract_strided_slice %267 {offsets = [0, 48], sizes = [8, 16], strides = [1, 1]} : vector<8x64xf32> to vector<8x16xf32>
    %283 = arith.negf %282 : vector<8x16xf32>
    %284 = math.exp %283 : vector<8x16xf32>
    %cst_70 = arith.constant 1.000000e+00 : f32
    %285 = vector.broadcast %cst_70 : f32 to vector<8x16xf32>
    %286 = arith.addf %285, %284 : vector<8x16xf32>
    %287 = arith.divf %285, %286 : vector<8x16xf32>
    %288 = arith.mulf %279, %264 : vector<8x16xf32>
    %289 = arith.mulf %273, %281 : vector<8x16xf32>
    %290 = arith.addf %288, %289 : vector<8x16xf32>
    %291 = math.tanh %290 : vector<8x16xf32>
    %292 = arith.mulf %287, %291 : vector<8x16xf32>
    %293 = vector.extract_strided_slice %262 {offsets = [8, 0], sizes = [8, 64], strides = [1, 1]} : vector<64x64xf32> to vector<8x64xf32>
    %cst_71 = arith.constant dense<0.000000e+00> : vector<8x64xf32>
    %294 = tpu.matmul %292, %257, %cst_71 {dimension_numbers = #tpu.dot_dimension_numbers<[1], [0], [0], [1], [0, 0, 1, 1], [], []>} : vector<8x16xf32>, vector<16x64xf32>, vector<8x64xf32> -> vector<8x64xf32>
    %295 = arith.addf %293, %294 : vector<8x64xf32>
    %296 = vector.extract_strided_slice %295 {offsets = [0, 0], sizes = [8, 16], strides = [1, 1]} : vector<8x64xf32> to vector<8x16xf32>
    %297 = arith.negf %296 : vector<8x16xf32>
    %298 = math.exp %297 : vector<8x16xf32>
    %cst_72 = arith.constant 1.000000e+00 : f32
    %299 = vector.broadcast %cst_72 : f32 to vector<8x16xf32>
    %300 = arith.addf %299, %298 : vector<8x16xf32>
    %301 = arith.divf %299, %300 : vector<8x16xf32>
    %302 = vector.extract_strided_slice %295 {offsets = [0, 16], sizes = [8, 16], strides = [1, 1]} : vector<8x64xf32> to vector<8x16xf32>
    %303 = arith.negf %302 : vector<8x16xf32>
    %304 = math.exp %303 : vector<8x16xf32>
    %cst_73 = arith.constant 1.000000e+00 : f32
    %305 = vector.broadcast %cst_73 : f32 to vector<8x16xf32>
    %306 = arith.addf %305, %304 : vector<8x16xf32>
    %307 = arith.divf %305, %306 : vector<8x16xf32>
    %308 = vector.extract_strided_slice %295 {offsets = [0, 32], sizes = [8, 16], strides = [1, 1]} : vector<8x64xf32> to vector<8x16xf32>
    %309 = math.tanh %308 : vector<8x16xf32>
    %310 = vector.extract_strided_slice %295 {offsets = [0, 48], sizes = [8, 16], strides = [1, 1]} : vector<8x64xf32> to vector<8x16xf32>
    %311 = arith.negf %310 : vector<8x16xf32>
    %312 = math.exp %311 : vector<8x16xf32>
    %cst_74 = arith.constant 1.000000e+00 : f32
    %313 = vector.broadcast %cst_74 : f32 to vector<8x16xf32>
    %314 = arith.addf %313, %312 : vector<8x16xf32>
    %315 = arith.divf %313, %314 : vector<8x16xf32>
    %316 = arith.mulf %307, %290 : vector<8x16xf32>
    %317 = arith.mulf %301, %309 : vector<8x16xf32>
    %318 = arith.addf %316, %317 : vector<8x16xf32>
    %319 = math.tanh %318 : vector<8x16xf32>
    %320 = arith.mulf %315, %319 : vector<8x16xf32>
    %321 = vector.extract_strided_slice %262 {offsets = [16, 0], sizes = [8, 64], strides = [1, 1]} : vector<64x64xf32> to vector<8x64xf32>
    %cst_75 = arith.constant dense<0.000000e+00> : vector<8x64xf32>
    %322 = tpu.matmul %320, %257, %cst_75 {dimension_numbers = #tpu.dot_dimension_numbers<[1], [0], [0], [1], [0, 0, 1, 1], [], []>} : vector<8x16xf32>, vector<16x64xf32>, vector<8x64xf32> -> vector<8x64xf32>
    %323 = arith.addf %321, %322 : vector<8x64xf32>
    %324 = vector.extract_strided_slice %323 {offsets = [0, 0], sizes = [8, 16], strides = [1, 1]} : vector<8x64xf32> to vector<8x16xf32>
    %325 = arith.negf %324 : vector<8x16xf32>
    %326 = math.exp %325 : vector<8x16xf32>
    %cst_76 = arith.constant 1.000000e+00 : f32
    %327 = vector.broadcast %cst_76 : f32 to vector<8x16xf32>
    %328 = arith.addf %327, %326 : vector<8x16xf32>
    %329 = arith.divf %327, %328 : vector<8x16xf32>
    %330 = vector.extract_strided_slice %323 {offsets = [0, 16], sizes = [8, 16], strides = [1, 1]} : vector<8x64xf32> to vector<8x16xf32>
    %331 = arith.negf %330 : vector<8x16xf32>
    %332 = math.exp %331 : vector<8x16xf32>
    %cst_77 = arith.constant 1.000000e+00 : f32
    %333 = vector.broadcast %cst_77 : f32 to vector<8x16xf32>
    %334 = arith.addf %333, %332 : vector<8x16xf32>
    %335 = arith.divf %333, %334 : vector<8x16xf32>
    %336 = vector.extract_strided_slice %323 {offsets = [0, 32], sizes = [8, 16], strides = [1, 1]} : vector<8x64xf32> to vector<8x16xf32>
    %337 = math.tanh %336 : vector<8x16xf32>
    %338 = vector.extract_strided_slice %323 {offsets = [0, 48], sizes = [8, 16], strides = [1, 1]} : vector<8x64xf32> to vector<8x16xf32>
    %339 = arith.negf %338 : vector<8x16xf32>
    %340 = math.exp %339 : vector<8x16xf32>
    %cst_78 = arith.constant 1.000000e+00 : f32
    %341 = vector.broadcast %cst_78 : f32 to vector<8x16xf32>
    %342 = arith.addf %341, %340 : vector<8x16xf32>
    %343 = arith.divf %341, %342 : vector<8x16xf32>
    %344 = arith.mulf %335, %318 : vector<8x16xf32>
    %345 = arith.mulf %329, %337 : vector<8x16xf32>
    %346 = arith.addf %344, %345 : vector<8x16xf32>
    %347 = math.tanh %346 : vector<8x16xf32>
    %348 = arith.mulf %343, %347 : vector<8x16xf32>
    %349 = vector.extract_strided_slice %262 {offsets = [24, 0], sizes = [8, 64], strides = [1, 1]} : vector<64x64xf32> to vector<8x64xf32>
    %cst_79 = arith.constant dense<0.000000e+00> : vector<8x64xf32>
    %350 = tpu.matmul %348, %257, %cst_79 {dimension_numbers = #tpu.dot_dimension_numbers<[1], [0], [0], [1], [0, 0, 1, 1], [], []>} : vector<8x16xf32>, vector<16x64xf32>, vector<8x64xf32> -> vector<8x64xf32>
    %351 = arith.addf %349, %350 : vector<8x64xf32>
    %352 = vector.extract_strided_slice %351 {offsets = [0, 0], sizes = [8, 16], strides = [1, 1]} : vector<8x64xf32> to vector<8x16xf32>
    %353 = arith.negf %352 : vector<8x16xf32>
    %354 = math.exp %353 : vector<8x16xf32>
    %cst_80 = arith.constant 1.000000e+00 : f32
    %355 = vector.broadcast %cst_80 : f32 to vector<8x16xf32>
    %356 = arith.addf %355, %354 : vector<8x16xf32>
    %357 = arith.divf %355, %356 : vector<8x16xf32>
    %358 = vector.extract_strided_slice %351 {offsets = [0, 16], sizes = [8, 16], strides = [1, 1]} : vector<8x64xf32> to vector<8x16xf32>
    %359 = arith.negf %358 : vector<8x16xf32>
    %360 = math.exp %359 : vector<8x16xf32>
    %cst_81 = arith.constant 1.000000e+00 : f32
    %361 = vector.broadcast %cst_81 : f32 to vector<8x16xf32>
    %362 = arith.addf %361, %360 : vector<8x16xf32>
    %363 = arith.divf %361, %362 : vector<8x16xf32>
    %364 = vector.extract_strided_slice %351 {offsets = [0, 32], sizes = [8, 16], strides = [1, 1]} : vector<8x64xf32> to vector<8x16xf32>
    %365 = math.tanh %364 : vector<8x16xf32>
    %366 = vector.extract_strided_slice %351 {offsets = [0, 48], sizes = [8, 16], strides = [1, 1]} : vector<8x64xf32> to vector<8x16xf32>
    %367 = arith.negf %366 : vector<8x16xf32>
    %368 = math.exp %367 : vector<8x16xf32>
    %cst_82 = arith.constant 1.000000e+00 : f32
    %369 = vector.broadcast %cst_82 : f32 to vector<8x16xf32>
    %370 = arith.addf %369, %368 : vector<8x16xf32>
    %371 = arith.divf %369, %370 : vector<8x16xf32>
    %372 = arith.mulf %363, %346 : vector<8x16xf32>
    %373 = arith.mulf %357, %365 : vector<8x16xf32>
    %374 = arith.addf %372, %373 : vector<8x16xf32>
    %375 = math.tanh %374 : vector<8x16xf32>
    %376 = arith.mulf %371, %375 : vector<8x16xf32>
    %377 = vector.extract_strided_slice %262 {offsets = [32, 0], sizes = [8, 64], strides = [1, 1]} : vector<64x64xf32> to vector<8x64xf32>
    %cst_83 = arith.constant dense<0.000000e+00> : vector<8x64xf32>
    %378 = tpu.matmul %376, %257, %cst_83 {dimension_numbers = #tpu.dot_dimension_numbers<[1], [0], [0], [1], [0, 0, 1, 1], [], []>} : vector<8x16xf32>, vector<16x64xf32>, vector<8x64xf32> -> vector<8x64xf32>
    %379 = arith.addf %377, %378 : vector<8x64xf32>
    %380 = vector.extract_strided_slice %379 {offsets = [0, 0], sizes = [8, 16], strides = [1, 1]} : vector<8x64xf32> to vector<8x16xf32>
    %381 = arith.negf %380 : vector<8x16xf32>
    %382 = math.exp %381 : vector<8x16xf32>
    %cst_84 = arith.constant 1.000000e+00 : f32
    %383 = vector.broadcast %cst_84 : f32 to vector<8x16xf32>
    %384 = arith.addf %383, %382 : vector<8x16xf32>
    %385 = arith.divf %383, %384 : vector<8x16xf32>
    %386 = vector.extract_strided_slice %379 {offsets = [0, 16], sizes = [8, 16], strides = [1, 1]} : vector<8x64xf32> to vector<8x16xf32>
    %387 = arith.negf %386 : vector<8x16xf32>
    %388 = math.exp %387 : vector<8x16xf32>
    %cst_85 = arith.constant 1.000000e+00 : f32
    %389 = vector.broadcast %cst_85 : f32 to vector<8x16xf32>
    %390 = arith.addf %389, %388 : vector<8x16xf32>
    %391 = arith.divf %389, %390 : vector<8x16xf32>
    %392 = vector.extract_strided_slice %379 {offsets = [0, 32], sizes = [8, 16], strides = [1, 1]} : vector<8x64xf32> to vector<8x16xf32>
    %393 = math.tanh %392 : vector<8x16xf32>
    %394 = vector.extract_strided_slice %379 {offsets = [0, 48], sizes = [8, 16], strides = [1, 1]} : vector<8x64xf32> to vector<8x16xf32>
    %395 = arith.negf %394 : vector<8x16xf32>
    %396 = math.exp %395 : vector<8x16xf32>
    %cst_86 = arith.constant 1.000000e+00 : f32
    %397 = vector.broadcast %cst_86 : f32 to vector<8x16xf32>
    %398 = arith.addf %397, %396 : vector<8x16xf32>
    %399 = arith.divf %397, %398 : vector<8x16xf32>
    %400 = arith.mulf %391, %374 : vector<8x16xf32>
    %401 = arith.mulf %385, %393 : vector<8x16xf32>
    %402 = arith.addf %400, %401 : vector<8x16xf32>
    %403 = math.tanh %402 : vector<8x16xf32>
    %404 = arith.mulf %399, %403 : vector<8x16xf32>
    %405 = vector.extract_strided_slice %262 {offsets = [40, 0], sizes = [8, 64], strides = [1, 1]} : vector<64x64xf32> to vector<8x64xf32>
    %cst_87 = arith.constant dense<0.000000e+00> : vector<8x64xf32>
    %406 = tpu.matmul %404, %257, %cst_87 {dimension_numbers = #tpu.dot_dimension_numbers<[1], [0], [0], [1], [0, 0, 1, 1], [], []>} : vector<8x16xf32>, vector<16x64xf32>, vector<8x64xf32> -> vector<8x64xf32>
    %407 = arith.addf %405, %406 : vector<8x64xf32>
    %408 = vector.extract_strided_slice %407 {offsets = [0, 0], sizes = [8, 16], strides = [1, 1]} : vector<8x64xf32> to vector<8x16xf32>
    %409 = arith.negf %408 : vector<8x16xf32>
    %410 = math.exp %409 : vector<8x16xf32>
    %cst_88 = arith.constant 1.000000e+00 : f32
    %411 = vector.broadcast %cst_88 : f32 to vector<8x16xf32>
    %412 = arith.addf %411, %410 : vector<8x16xf32>
    %413 = arith.divf %411, %412 : vector<8x16xf32>
    %414 = vector.extract_strided_slice %407 {offsets = [0, 16], sizes = [8, 16], strides = [1, 1]} : vector<8x64xf32> to vector<8x16xf32>
    %415 = arith.negf %414 : vector<8x16xf32>
    %416 = math.exp %415 : vector<8x16xf32>
    %cst_89 = arith.constant 1.000000e+00 : f32
    %417 = vector.broadcast %cst_89 : f32 to vector<8x16xf32>
    %418 = arith.addf %417, %416 : vector<8x16xf32>
    %419 = arith.divf %417, %418 : vector<8x16xf32>
    %420 = vector.extract_strided_slice %407 {offsets = [0, 32], sizes = [8, 16], strides = [1, 1]} : vector<8x64xf32> to vector<8x16xf32>
    %421 = math.tanh %420 : vector<8x16xf32>
    %422 = vector.extract_strided_slice %407 {offsets = [0, 48], sizes = [8, 16], strides = [1, 1]} : vector<8x64xf32> to vector<8x16xf32>
    %423 = arith.negf %422 : vector<8x16xf32>
    %424 = math.exp %423 : vector<8x16xf32>
    %cst_90 = arith.constant 1.000000e+00 : f32
    %425 = vector.broadcast %cst_90 : f32 to vector<8x16xf32>
    %426 = arith.addf %425, %424 : vector<8x16xf32>
    %427 = arith.divf %425, %426 : vector<8x16xf32>
    %428 = arith.mulf %419, %402 : vector<8x16xf32>
    %429 = arith.mulf %413, %421 : vector<8x16xf32>
    %430 = arith.addf %428, %429 : vector<8x16xf32>
    %431 = math.tanh %430 : vector<8x16xf32>
    %432 = arith.mulf %427, %431 : vector<8x16xf32>
    %433 = vector.extract_strided_slice %262 {offsets = [48, 0], sizes = [8, 64], strides = [1, 1]} : vector<64x64xf32> to vector<8x64xf32>
    %cst_91 = arith.constant dense<0.000000e+00> : vector<8x64xf32>
    %434 = tpu.matmul %432, %257, %cst_91 {dimension_numbers = #tpu.dot_dimension_numbers<[1], [0], [0], [1], [0, 0, 1, 1], [], []>} : vector<8x16xf32>, vector<16x64xf32>, vector<8x64xf32> -> vector<8x64xf32>
    %435 = arith.addf %433, %434 : vector<8x64xf32>
    %436 = vector.extract_strided_slice %435 {offsets = [0, 0], sizes = [8, 16], strides = [1, 1]} : vector<8x64xf32> to vector<8x16xf32>
    %437 = arith.negf %436 : vector<8x16xf32>
    %438 = math.exp %437 : vector<8x16xf32>
    %cst_92 = arith.constant 1.000000e+00 : f32
    %439 = vector.broadcast %cst_92 : f32 to vector<8x16xf32>
    %440 = arith.addf %439, %438 : vector<8x16xf32>
    %441 = arith.divf %439, %440 : vector<8x16xf32>
    %442 = vector.extract_strided_slice %435 {offsets = [0, 16], sizes = [8, 16], strides = [1, 1]} : vector<8x64xf32> to vector<8x16xf32>
    %443 = arith.negf %442 : vector<8x16xf32>
    %444 = math.exp %443 : vector<8x16xf32>
    %cst_93 = arith.constant 1.000000e+00 : f32
    %445 = vector.broadcast %cst_93 : f32 to vector<8x16xf32>
    %446 = arith.addf %445, %444 : vector<8x16xf32>
    %447 = arith.divf %445, %446 : vector<8x16xf32>
    %448 = vector.extract_strided_slice %435 {offsets = [0, 32], sizes = [8, 16], strides = [1, 1]} : vector<8x64xf32> to vector<8x16xf32>
    %449 = math.tanh %448 : vector<8x16xf32>
    %450 = vector.extract_strided_slice %435 {offsets = [0, 48], sizes = [8, 16], strides = [1, 1]} : vector<8x64xf32> to vector<8x16xf32>
    %451 = arith.negf %450 : vector<8x16xf32>
    %452 = math.exp %451 : vector<8x16xf32>
    %cst_94 = arith.constant 1.000000e+00 : f32
    %453 = vector.broadcast %cst_94 : f32 to vector<8x16xf32>
    %454 = arith.addf %453, %452 : vector<8x16xf32>
    %455 = arith.divf %453, %454 : vector<8x16xf32>
    %456 = arith.mulf %447, %430 : vector<8x16xf32>
    %457 = arith.mulf %441, %449 : vector<8x16xf32>
    %458 = arith.addf %456, %457 : vector<8x16xf32>
    %459 = math.tanh %458 : vector<8x16xf32>
    %460 = arith.mulf %455, %459 : vector<8x16xf32>
    %461 = vector.extract_strided_slice %262 {offsets = [56, 0], sizes = [8, 64], strides = [1, 1]} : vector<64x64xf32> to vector<8x64xf32>
    %cst_95 = arith.constant dense<0.000000e+00> : vector<8x64xf32>
    %462 = tpu.matmul %460, %257, %cst_95 {dimension_numbers = #tpu.dot_dimension_numbers<[1], [0], [0], [1], [0, 0, 1, 1], [], []>} : vector<8x16xf32>, vector<16x64xf32>, vector<8x64xf32> -> vector<8x64xf32>
    %463 = arith.addf %461, %462 : vector<8x64xf32>
    %464 = vector.extract_strided_slice %463 {offsets = [0, 0], sizes = [8, 16], strides = [1, 1]} : vector<8x64xf32> to vector<8x16xf32>
    %465 = arith.negf %464 : vector<8x16xf32>
    %466 = math.exp %465 : vector<8x16xf32>
    %cst_96 = arith.constant 1.000000e+00 : f32
    %467 = vector.broadcast %cst_96 : f32 to vector<8x16xf32>
    %468 = arith.addf %467, %466 : vector<8x16xf32>
    %469 = arith.divf %467, %468 : vector<8x16xf32>
    %470 = vector.extract_strided_slice %463 {offsets = [0, 16], sizes = [8, 16], strides = [1, 1]} : vector<8x64xf32> to vector<8x16xf32>
    %471 = arith.negf %470 : vector<8x16xf32>
    %472 = math.exp %471 : vector<8x16xf32>
    %cst_97 = arith.constant 1.000000e+00 : f32
    %473 = vector.broadcast %cst_97 : f32 to vector<8x16xf32>
    %474 = arith.addf %473, %472 : vector<8x16xf32>
    %475 = arith.divf %473, %474 : vector<8x16xf32>
    %476 = vector.extract_strided_slice %463 {offsets = [0, 32], sizes = [8, 16], strides = [1, 1]} : vector<8x64xf32> to vector<8x16xf32>
    %477 = math.tanh %476 : vector<8x16xf32>
    %478 = vector.extract_strided_slice %463 {offsets = [0, 48], sizes = [8, 16], strides = [1, 1]} : vector<8x64xf32> to vector<8x16xf32>
    %479 = arith.negf %478 : vector<8x16xf32>
    %480 = math.exp %479 : vector<8x16xf32>
    %cst_98 = arith.constant 1.000000e+00 : f32
    %481 = vector.broadcast %cst_98 : f32 to vector<8x16xf32>
    %482 = arith.addf %481, %480 : vector<8x16xf32>
    %483 = arith.divf %481, %482 : vector<8x16xf32>
    %484 = arith.mulf %475, %458 : vector<8x16xf32>
    %485 = arith.mulf %469, %477 : vector<8x16xf32>
    %486 = arith.addf %484, %485 : vector<8x16xf32>
    %487 = math.tanh %486 : vector<8x16xf32>
    %488 = arith.mulf %483, %487 : vector<8x16xf32>
    %489 = tpu.concatenate %252, %250, %488, %486 in 1 : vector<8x16xf32>, vector<8x16xf32>, vector<8x16xf32>, vector<8x16xf32> -> vector<8x64xf32>
    %490 = math.tanh %489 : vector<8x64xf32>
    %c0_99 = arith.constant 0 : index
    %c0_100 = arith.constant 0 : index
    %491 = vector.load %arg8[%c0_99, %c0_100] : memref<64x32xf32, #tpu.memory_space<vmem>>, vector<64x32xf32>
    %cst_101 = arith.constant dense<0.000000e+00> : vector<8x32xf32>
    %492 = tpu.matmul %490, %491, %cst_101 {dimension_numbers = #tpu.dot_dimension_numbers<[1], [0], [0], [1], [0, 0, 1, 1], [], []>} : vector<8x64xf32>, vector<64x32xf32>, vector<8x32xf32> -> vector<8x32xf32>
    %c0_102 = arith.constant 0 : index
    %c0_103 = arith.constant 0 : index
    %493 = vector.load %arg9[%c0_102, %c0_103] : memref<1x32xf32, #tpu.memory_space<vmem>>, vector<1x32xf32>
    %494 = vector.broadcast %493 : vector<1x32xf32> to vector<8x32xf32>
    %495 = arith.addf %492, %494 : vector<8x32xf32>
    %c0_104 = arith.constant 0 : index
    %c0_105 = arith.constant 0 : index
    %c0_106 = arith.constant 0 : index
    %496 = vector.load %arg10[%c0_104, %c0_105, %c0_106] : memref<2x32x160xf32, #tpu.memory_space<vmem>>, vector<1x32x160xf32>
    %497 = vector.shape_cast %496 : vector<1x32x160xf32> to vector<32x160xf32>
    %cst_107 = arith.constant dense<0.000000e+00> : vector<8x160xf32>
    %498 = tpu.matmul %15, %497, %cst_107 {dimension_numbers = #tpu.dot_dimension_numbers<[1], [0], [0], [1], [0, 0, 1, 1], [], []>} : vector<8x32xf32>, vector<32x160xf32>, vector<8x160xf32> -> vector<8x160xf32>
    %c0_108 = arith.constant 0 : index
    %c0_109 = arith.constant 0 : index
    %c0_110 = arith.constant 0 : index
    %499 = vector.load %arg11[%c0_108, %c0_109, %c0_110] : memref<2x1x160xf32, #tpu.memory_space<vmem>>, vector<1x1x160xf32>
    %500 = vector.shape_cast %499 : vector<1x1x160xf32> to vector<1x160xf32>
    %501 = vector.broadcast %500 : vector<1x160xf32> to vector<8x160xf32>
    %502 = arith.addf %498, %501 : vector<8x160xf32>
    %503 = math.tanh %502 : vector<8x160xf32>
    %c1_111 = arith.constant 1 : index
    %c0_112 = arith.constant 0 : index
    %c0_113 = arith.constant 0 : index
    %504 = vector.load %arg10[%c1_111, %c0_112, %c0_113] : memref<2x32x160xf32, #tpu.memory_space<vmem>>, vector<1x32x160xf32>
    %505 = vector.shape_cast %504 : vector<1x32x160xf32> to vector<32x160xf32>
    %cst_114 = arith.constant dense<0.000000e+00> : vector<8x160xf32>
    %506 = tpu.matmul %495, %505, %cst_114 {dimension_numbers = #tpu.dot_dimension_numbers<[1], [0], [0], [1], [0, 0, 1, 1], [], []>} : vector<8x32xf32>, vector<32x160xf32>, vector<8x160xf32> -> vector<8x160xf32>
    %c1_115 = arith.constant 1 : index
    %c0_116 = arith.constant 0 : index
    %c0_117 = arith.constant 0 : index
    %507 = vector.load %arg11[%c1_115, %c0_116, %c0_117] : memref<2x1x160xf32, #tpu.memory_space<vmem>>, vector<1x1x160xf32>
    %508 = vector.shape_cast %507 : vector<1x1x160xf32> to vector<1x160xf32>
    %509 = vector.broadcast %508 : vector<1x160xf32> to vector<8x160xf32>
    %510 = arith.addf %506, %509 : vector<8x160xf32>
    %511 = math.tanh %510 : vector<8x160xf32>
    %512 = arith.mulf %511, %503 : vector<8x160xf32>
    %513 = vector.extract_strided_slice %512 {offsets = [0, 0], sizes = [8, 32], strides = [1, 1]} : vector<8x160xf32> to vector<8x32xf32>
    %514 = vector.extract_strided_slice %512 {offsets = [0, 32], sizes = [8, 32], strides = [1, 1]} : vector<8x160xf32> to vector<8x32xf32>
    %515 = arith.addf %513, %514 : vector<8x32xf32>
    %516 = vector.extract_strided_slice %512 {offsets = [0, 64], sizes = [8, 32], strides = [1, 1]} : vector<8x160xf32> to vector<8x32xf32>
    %517 = arith.addf %515, %516 : vector<8x32xf32>
    %518 = vector.extract_strided_slice %512 {offsets = [0, 96], sizes = [8, 32], strides = [1, 1]} : vector<8x160xf32> to vector<8x32xf32>
    %519 = arith.addf %517, %518 : vector<8x32xf32>
    %520 = vector.extract_strided_slice %512 {offsets = [0, 128], sizes = [8, 32], strides = [1, 1]} : vector<8x160xf32> to vector<8x32xf32>
    %521 = arith.addf %519, %520 : vector<8x32xf32>
    %522 = math.tanh %521 : vector<8x32xf32>
    %c0_118 = arith.constant 0 : index
    %c0_119 = arith.constant 0 : index
    %523 = vector.load %arg12[%c0_118, %c0_119] : memref<32x16xf32, #tpu.memory_space<vmem>>, vector<32x16xf32>
    %cst_120 = arith.constant dense<0.000000e+00> : vector<8x16xf32>
    %524 = tpu.matmul %522, %523, %cst_120 {dimension_numbers = #tpu.dot_dimension_numbers<[1], [0], [0], [1], [0, 0, 1, 1], [], []>} : vector<8x32xf32>, vector<32x16xf32>, vector<8x16xf32> -> vector<8x16xf32>
    %c0_121 = arith.constant 0 : index
    %c0_122 = arith.constant 0 : index
    %525 = vector.load %arg13[%c0_121, %c0_122] : memref<1x16xf32, #tpu.memory_space<vmem>>, vector<1x16xf32>
    %526 = vector.broadcast %525 : vector<1x16xf32> to vector<8x16xf32>
    %527 = arith.addf %524, %526 : vector<8x16xf32>
    %c0_123 = arith.constant 0 : index
    %c0_124 = arith.constant 0 : index
    %528 = vector.load %arg14[%c0_123, %c0_124] : memref<8x16xf32, #tpu.memory_space<vmem>>, vector<8x16xf32>
    tpu.vector_store %arg14[%c0_123, %c0_124], %527 {strides = array<i32>} : memref<8x16xf32, #tpu.memory_space<vmem>>, vector<8x16xf32>,
    return
  }
}

</mosaic_0001>

<bundles_post_ra>
// kernel: _vqa_forward_impl.1
= control target key start
LH: loop header
LB: loop body
LE: loop exit
PB: predicated region body
PF: predicated region fallthrough
CT: control target
= control target key end

     0   :  { %v3074_v1 = vmov 0.0   ;;  %vm74_vm0 = vcmask 523264   ;;  %s3746_s0 = inlined_call_operand.vmem [shape: f32[8,192], index: 0, kind: input, shape index: {}]   ;;  %s3747_s1 = inlined_call_operand.vmem [shape: f32[64,16], index: 1, kind: input, shape index: {}]   ;;  %s3748_s2 = inlined_call_operand.vmem [shape: f32[192,64], index: 2, kind: input, shape index: {}]   ;;  %s3749_s3 = inlined_call_operand.vmem [shape: f32[64,32], index: 3, kind: input, shape index: {}]   ;;  %s3750_s4 = inlined_call_operand.vmem [shape: f32[1,32], index: 4, kind: input, shape index: {}]   ;;  %s3751_s5 = inlined_call_operand.vmem [shape: f32[2,16,64], index: 5, kind: input, shape index: {}]   ;;  %s3752_s6 = inlined_call_operand.vmem [shape: f32[2,16,64], index: 6, kind: input, shape index: {}]   ;;  %s3753_s7 = inlined_call_operand.vmem [shape: f32[2,1,64], index: 7, kind: input, shape index: {}]   ;;  %s3754_s8 = inlined_call_operand.vmem [shape: f32[64,32], index: 8, kind: input, shape index: {}]   ;;  %s3755_s9 = inlined_call_operand.vmem [shape: f32[1,32], index: 9, kind: input, shape index: {}]   ;;  %s3756_s10 = inlined_call_operand.vmem [shape: f32[2,32,160], index: 10, kind: input, shape index: {}]   ;;  %s3757_s11 = inlined_call_operand.vmem [shape: f32[2,1,160], index: 11, kind: input, shape index: {}]   ;;  %s3758_s12 = inlined_call_operand.vmem [shape: f32[32,16], index: 12, kind: input, shape index: {}]   ;;  %s3759_s13 = inlined_call_operand.vmem [shape: f32[1,16], index: 13, kind: input, shape index: {}]   ;;  %s3760_s14 = inlined_call_operand.hbm [shape: f32[8,16], index: 14, kind: output, shape index: {}]  }
   0x1   :  { %v65_v0 = vld [vmem:[%s3748_s2 + $0x78] sm:$0xff]  ;;  %78 = vmatprep.subr.mxu0 %v3074_v1  ;;  %v64_v2 = vld [vmem:[%s3748_s2 + $0x70] sm:$0xff]  ;;  %2692 = vmatprep.subr.mxu1 %v3074_v1  ;;  %v63_v3 = vld [vmem:[%s3748_s2 + $0x68] sm:$0xff] }
   0x2   :  { %79 = vmatpush1.msra.mxu0 %v65_v0  ;;  %v62_v4 = vld [vmem:[%s3748_s2 + $0x60] sm:$0xff]  ;;  %v61_v5 = vld [vmem:[%s3748_s2 + $0x58] sm:$0xff]  ;;  %v49_v6 = vld [vmem:[%s3746_s0 + $0x8] sm:$0xff] }
   0x3   :  { %80 = vmatprep.subr.mxu0 %v3074_v1  ;;  %v156_v7 = vld [vmem:[%s3749_s3 + $0x38] sm:$0xff]  ;;  %v60_v8 = vld [vmem:[%s3748_s2 + $0x50] sm:$0xff]  ;;  %2530 = vmatprep.mubr.msk.f32.mxu0 %vm74_vm0, %v49_v6  ;;  %v59_v10 = vld [vmem:[%s3748_s2 + $0x48] sm:$0xff] }
   0x4   :  { %81 = vmatpush1.msra.mxu0 %v64_v2  ;;  %v155_v9 = vld [vmem:[%s3749_s3 + $0x30] sm:$0xff]  ;;  %2693 = vmatpush3.msra.mxu1 %v156_v7  ;;  %v154_v11 = vld [vmem:[%s3749_s3 + $0x28] sm:$0xff] }
   0x5   :  { %82 = vmatprep.subr.mxu0 %v3074_v1  ;;  %2694 = vmatprep.subr.mxu1 %v3074_v1 }
   0x6   :  { %83 = vmatpush1.msra.mxu0 %v63_v3 }
   0x7   :  { %84 = vmatprep.subr.mxu0 %v3074_v1 }
   0x8   :  { %85 = vmatpush1.msra.mxu0 %v62_v4 }
   0x9   :  { %86 = vmatprep.subr.mxu0 %v3074_v1 }
   0xa   :  { %87 = vmatpush1.msra.mxu0 %v61_v5 }
   0xb   :  { %88 = vmatprep.subr.mxu0 %v3074_v1 }
   0xc   :  { %19 = vsyncpa [#allocation3], 0  ;;  %89 = vmatpush1.msra.mxu0 %v60_v8  ;;  %2695 = vmatpush3.msra.mxu1 %v155_v9  ;;  %v58_v12 = vld [vmem:[%s3748_s2 + $0x40] sm:$0xff]  ;;  %v57_v14 = vld [vmem:[%s3748_s2 + $0x38] sm:$0xff]  ;;  %vm3075_vm1 = vmmov 0   ;;  %vm271_vm2 = vcmask 130048  }
   0xd   :  { %90 = vmatprep.subr.mxu0 %v3074_v1  ;;  %2696 = vmatprep.subr.mxu1 %v3074_v1  ;;  %v153_v13 = vld [vmem:[%s3749_s3 + $0x20] sm:$0xff]  ;;  %v152_v15 = vld [vmem:[%s3749_s3 + $0x18] sm:$0xff]  ;;  %v56_v16 = vld [vmem:[%s3748_s2 + $0x30] sm:$0xff]  ;;  %s3076_s20 = smov 96   ;;  %s3077_s21 = smov 16   ;;  %vm238_vm3 = vcmask 261120  }
   0xe   :  { %91 = vmatpush1.msra.mxu0 %v59_v10  ;;  %2697 = vmatpush3.msra.mxu1 %v154_v11  ;;  %v151_v17 = vld [vmem:[%s3749_s3 + $0x10] sm:$0xff]  ;;  %v55_v18 = vld [vmem:[%s3748_s2 + $0x28] sm:$0xff]  ;;  %v54_v20 = vld [vmem:[%s3748_s2 + $0x20] sm:$0xff]  ;;  %s3078_s22 = smov 32   ;;  %s3079_s23 = smov 80   ;;  %vm2129_vm4 = vcmask 392192  }
   0xf   :  { %92 = vmatprep.subr.mxu0 %v3074_v1  ;;  %2698 = vmatprep.subr.mxu1 %v3074_v1  ;;  %v150_v19 = vld [vmem:[%s3749_s3 + $0x8] sm:$0xff]  ;;  %v53_v21 = vld [vmem:[%s3748_s2 + $0x18] sm:$0xff]  ;;  %v52_v22 = vld [vmem:[%s3748_s2 + $0x10] sm:$0xff]  ;;  %s3080_s28 = smov 112   ;;  %s3082_s29 = smov [#allocation2]  }
  0x10   :  { %93 = vmatpush1.msra.mxu0 %v58_v12  ;;  %2699 = vmatpush3.msra.mxu1 %v153_v13  ;;  %v51_v23 = vld [vmem:[%s3748_s2 + $0x8] sm:$0xff]  ;;  %v50_v24 = vld [vmem:[%s3748_s2] sm:$0xff]  ;;  %v73_v25 = vld [vmem:[%s3748_s2 + $0xb8] sm:$0xff]  ;;  %s2522_s30 = sshll.u32 %s3082_s29, 4  ;;  %s2523_s30 = int_to_ptr.vmem [resolvable:$true] %s2522_s30 }
  0x11   :  { %94 = vmatprep.subr.mxu0 %v3074_v1  ;;  %2700 = vmatprep.subr.mxu1 %v3074_v1  ;;  %v72_v26 = vld [vmem:[%s3748_s2 + $0xb0] sm:$0xff]  ;;  %v71_v27 = vld [vmem:[%s3748_s2 + $0xa8] sm:$0xff]  ;;  %v70_v28 = vld [vmem:[%s3748_s2 + $0xa0] sm:$0xff]  ;;  %p3057_p1 = scmp.lt.s32.totalorder %s2523_s30, %s2523_s30 }
  0x12   :  { %95 = vmatpush1.msra.mxu0 %v57_v14  ;;  %2701 = vmatpush3.msra.mxu1 %v152_v15  ;;  %v69_v29 = vld [vmem:[%s3748_s2 + $0x98] sm:$0xff]  ;;  %v68_v30 = vld [vmem:[%s3748_s2 + $0x90] sm:$0xff]  ;;  %v67_v31 = vld [vmem:[%s3748_s2 + $0x88] sm:$0xff] }
  0x13   :  { %96 = vmatprep.subr.mxu0 %v3074_v1  ;;  %2702 = vmatprep.subr.mxu1 %v3074_v1  ;;  %v66_v32 = vld [vmem:[%s3748_s2 + $0x80] sm:$0xff]  ;;  %v261_v35 = vld [vmem:[%s3751_s5 + $0x8] sm:$0xff]  ;;  %v246_v40 = vld [vmem:[%s3747_s1 + $0x10] sm:$0xff] }
  0x14   :  { %97 = vmatpush1.msra.mxu0 %v56_v16  ;;  %2703 = vmatpush3.msra.mxu1 %v151_v17  ;;  %v48_v33 = vld [vmem:[%s3746_s0] sm:$0xff]  ;;  %v3304_v36 = vld [vmem:[%s3752_s6 + $0x8] sm:$0xff]  ;;  %v247_v41 = vld [vmem:[%s3747_s1 + $0x18] sm:$0xff] }
  0x15   :  { %98 = vmatprep.subr.mxu0 %v3074_v1  ;;  %2704 = vmatprep.subr.mxu1 %v3074_v1  ;;  %v149_v34 = vld [vmem:[%s3749_s3] sm:$0xff]  ;;  %v245_v39 = vld [vmem:[%s3747_s1 + $0x8] sm:$0xff]  ;;  %v250_v44 = vld [vmem:[%s3747_s1 + $0x30] sm:$0xff] }
  0x16   :  { %99 = vmatpush1.msra.mxu0 %v55_v18  ;;  %2705 = vmatpush3.msra.mxu1 %v150_v19  ;;  %v3311_v37 = vld [vmem:[%s3752_s6] sm:$0xff]  ;;  %v249_v43 = vld [vmem:[%s3747_s1 + $0x28] sm:$0xff]  ;;  %v251_v46 = vld [vmem:[%s3747_s1 + $0x38] sm:$0xff] }
  0x17   :  { %100 = vmatprep.subr.mxu0 %v3074_v1  ;;  %2706 = vmatprep.subr.mxu1 %v3074_v1  ;;  %v244_v38 = vld [vmem:[%s3747_s1] sm:$0xff] }
  0x18   :  { %101 = vmatpush1.msra.mxu0 %v54_v20  ;;  %2707 = vmatpush3.msra.mxu1 %v149_v34  ;;  %2894 = vtanh.f32 %v244_v38  ;;  %v248_v42 = vld [vmem:[%s3747_s1 + $0x20] sm:$0xff] }
  0x19   :  { %102 = vmatprep.subr.mxu0 %v3074_v1  ;;  %2708 = vmatprep.mubr.msk.f32.mxu1 %vm3075_vm1, %v3074_v1  ;;  %2896 = vtanh.f32 %v245_v39  ;;  %v260_v50 = vld [vmem:[%s3751_s5] sm:$0xff] }
  0x1a   :  { %103 = vmatpush1.msra.mxu0 %v53_v21  ;;  %2711 = vmatprep.subr.mxu1 %v261_v35  ;;  %2898 = vtanh.f32 %v246_v40  ;;  %v2533_v60 = vld [vmem:[%s3753_s7] ss:$0 sm:$0xff] }
  0x1b   :  { %104 = vmatprep.subr.mxu0 %v3074_v1  ;;  %2900 = vtanh.f32 %v247_v41 }
  0x1c   :  { %105 = vmatpush1.msra.mxu0 %v52_v22  ;;  %2902 = vtanh.f32 %v248_v42 }
  0x1d   :  { %106 = vmatprep.subr.mxu0 %v3074_v1  ;;  %2904 = vtanh.f32 %v249_v43 }
  0x1e   :  { %107 = vmatpush1.msra.mxu0 %v51_v23  ;;  %2906 = vtanh.f32 %v250_v44 }
  0x1f   :  { %108 = vmatprep.subr.mxu0 %v3074_v1  ;;  %2908 = vtanh.f32 %v251_v46 }
  0x20   :  { %109 = vmatpush1.msra.mxu0 %v50_v24 }
  0x21   :  { %126 = vmatprep.subr.mxu0 %v3074_v1 }
  0x22   :  { %127 = vmatpush2.msra.mxu0 %v73_v25 }
  0x23   :  { %128 = vmatprep.subr.mxu0 %v3074_v1 }
  0x24   :  { %129 = vmatpush2.msra.mxu0 %v72_v26 }
  0x25   :  { %130 = vmatprep.subr.mxu0 %v3074_v1  ;;  %v2895_v47 = vpop.eup %2894 }
  0x26   :  { %131 = vmatpush2.msra.mxu0 %v71_v27  ;;  %v2897_v51 = vpop.eup %2896 }
  0x27   :  { %132 = vmatprep.subr.mxu0 %v3074_v1  ;;  %v2899_v52 = vpop.eup %2898 }
  0x28   :  { %133 = vmatpush2.msra.mxu0 %v70_v28  ;;  %v2901_v53 = vpop.eup %2900 }
  0x29   :  { %134 = vmatprep.subr.mxu0 %v3074_v1  ;;  %v2903_v54 = vpop.eup %2902 }
  0x2a   :  { %135 = vmatpush2.msra.mxu0 %v69_v29  ;;  %v2905_v55 = vpop.eup %2904 }
  0x2b   :  { %136 = vmatprep.subr.mxu0 %v3074_v1  ;;  %v2907_v56 = vpop.eup %2906 }
  0x2c   :  { %137 = vmatpush2.msra.mxu0 %v68_v30  ;;  %v2909_v57 = vpop.eup %2908 }
  0x2d   :  { %138 = vmatprep.subr.mxu0 %v3074_v1 }
  0x2e   :  { %139 = vmatpush2.msra.mxu0 %v67_v31 }
  0x2f   :  { %140 = vmatprep.subr.mxu0 %v3074_v1 }
  0x30   :  { %141 = vmatpush2.msra.mxu0 %v66_v32 }
  0x31   :  { %143 = vmatmul.mubr.f32.vlgmr.msra.gmra.mxu0 %v48_v33  ;;  %2769 = vmatprep.subr.mxu0 %v3074_v1 }
  0x32   :  { %2773 = vmatprep.mubr.msk.f32.mxu0 %vm3075_vm1, %v3074_v1  ;;  %2770 = vmatpush3.msra.mxu0 %v3304_v36 }
  0x33   :  { %2771 = vmatprep.subr.mxu0 %v3074_v1 }
  0x34   :  { %2772 = vmatpush3.msra.mxu0 %v3311_v37 }
  0xf1   :  { %v144_v45 = vpop.f32.mrf.mxu0 }
  0xf2   :  { %v148_v48 = vmax.f32 %v144_v45, 0.0 }
  0xf3   :  { %v146_v49 = vpop.f32.mrf.mxu0 }
  0xf4   :  { %2709 = vmatmul.mubr.msk.f32.vlgmr.msra.gmra.mxu1 %vm74_vm0, %v148_v48 }
  0xf5   :  { %2712 = vmatpush3.msra.mxu1 %v261_v35  ;;  %2715 = vmatprep.mubr.msk.f32.mxu1 %vm271_vm2, %v2895_v47 }
  0xf6   :  { %2713 = vmatprep.subr.mxu1 %v260_v50 }
  0xf7   :  { %2714 = vmatpush3.msra.mxu1 %v260_v50 }
  0xf8   :  { %2727 = vmatprep.subr.mxu1 %v3074_v1  ;;  %2716 = vmatmul.mubr.msk.f32.vlgmr.msra.gmra.mxu1 %vm271_vm2, %v2897_v51 }
  0xf9   :  { %2728 = vmatpush3.msra.mxu1 %v3304_v36  ;;  %2718 = vmatprep.mubr.msk.f32.mxu1 %vm271_vm2, %v2899_v52 }
  0xfa   :  { %2729 = vmatprep.subr.mxu1 %v3074_v1 }
  0xfb   :  { %2730 = vmatpush3.msra.mxu1 %v3311_v37 }
  0xfc   :  { %2719 = vmatmul.mubr.msk.f32.gmra.mxu1 %vm271_vm2, %v2901_v53  ;;  %2734 = vmatprep.subr.mxu1 %v3074_v1 }
  0xfd   :  { %2721 = vmatprep.mubr.msk.f32.mxu1 %vm271_vm2, %v2903_v54 }
 0x100   :  { %2722 = vmatmul.mubr.msk.f32.gmra.mxu1 %vm271_vm2, %v2905_v55 }
 0x101   :  { %2724 = vmatprep.mubr.msk.f32.mxu1 %vm271_vm2, %v2907_v56 }
 0x104   :  { %2725 = vmatmul.mubr.msk.f32.gmra.mxu1 %vm271_vm2, %v2909_v57 }
 0x105   :  { %2731 = vmatprep.mubr.msk.f32.mxu1 %vm3075_vm1, %v3074_v1 }
 0x108   :  { %2732 = vmatmul.mubr.f32.vlgmr.msra.gmra.mxu1 %v3074_v1 }
 0x109   :  { %2735 = vmatpush3.msra.mxu1 %v3304_v36  ;;  %2738 = vmatprep.mubr.msk.f32.mxu1 %vm3075_vm1, %v3074_v1 }
 0x10a   :  { %2736 = vmatprep.subr.mxu1 %v3074_v1 }
 0x10b   :  { %2737 = vmatpush3.msra.mxu1 %v3311_v37 }
 0x10c   :  { %2741 = vmatprep.subr.mxu1 %v3074_v1 }
 0x1b4   :  { %v3364_v58 = vpop.f32.mrf.mxu1 }
 0x1b6   :  { %v2710_v59 = vpop.f32.mrf.mxu1 }
 0x1b8   :  { %v2717_v61 = vpop.f32.mrf.mxu1 }
 0x1b9   :  { %v368_v62 = vadd.f32 %v2717_v61, %v2533_v60 }
 0x1ba   :  { %v362_v63 = vpop.f32.mrf.mxu1 }
 0x1bb   :  { %v363_v12 = vadd.f32 %v2533_v60, %v362_v63 }
 0x1bc   :  { %v2720_v0 = vpop.f32.mrf.mxu1 }
 0x1bd   :  { %v3369_v2 = vadd.f32 %v2720_v0, %v2533_v60 }
 0x1be   :  { %v372_v3 = vpop.f32.mrf.mxu1 }
 0x1bf   :  { %v3371_v4 = vadd.f32 %v2533_v60, %v372_v3 }
 0x1c0   :  { %v2723_v5 = vpop.f32.mrf.mxu1 }
 0x1c1   :  { %v3373_v6 = vadd.f32 %v2723_v5, %v2533_v60 }
 0x1c2   :  { %v382_v7 = vpop.f32.mrf.mxu1 }
 0x1c3   :  { %v3375_v8 = vadd.f32 %v2533_v60, %v382_v7 }
 0x1c4   :  { %v2726_v9 = vpop.f32.mrf.mxu1 }
 0x1c5   :  { %v3377_v10 = vadd.f32 %v2726_v9, %v2533_v60 }
 0x1c6   :  { %v392_v11 = vpop.f32.mrf.mxu1 }
 0x1c7   :  { %v3379_v13 = vadd.f32 %v2533_v60, %v392_v11 }
 0x1c8   :  { %v470_v14 = vpop.f32.mrf.mxu1 }
 0x1c9   :  { %v474_v15 = vadd.f32 %v470_v14, %v363_v12 }
 0x1ca   :  { %v2733_v16 = vpop.f32.mrf.mxu1 }
 0x1cb   :  { %2910 = vtanh.f32 %v474_v15  ;;  %v2542_v18 = vmul.f32 -1.442695, %v474_v15 }
 0x1cd   :  { %2912 = vpow2.f32 %v2542_v18 }
 0x1d8   :  { %v2911_v17 = vpop.eup %2910 }
 0x1d9   :  { %484 = vrot.lane.b32.xlu0 %v2911_v17, %s3076_s20 }
 0x1da   :  { %v2913_v19 = vpop.eup %2912 }
 0x1db   :  { %v478_v20 = vadd.f32 1.0, %v2913_v19 }
 0x1dd   :  { %2914 = vrcp.f32 %v478_v20 }
 0x1ea   :  { %v2915_v21 = vpop.eup %2914 }
 0x1eb   :  { %v482_v24 = vmul.f32 0.0, %v2915_v21 }
 0x24b   :  { %v485_v22 = vpop.permute.xlu0 %484 }
 0x24c   :  { %v487_v23 = vmul.f32 %v2915_v21, %v485_v22 }
 0x24e   :  { %489 = vrot.lane.b32.xlu0 %v487_v23, %s3077_s21 }
 0x2c0   :  { %v490_v25 = vpop.permute.xlu0 %489 }
 0x2c1   :  { %v492_v26 = vadd.f32 %v490_v25, %v482_v24 }
 0x2c3   :  { %2916 = vtanh.f32 %v492_v26 }
 0x2d0   :  { %v2917_v27 = vpop.eup %2916 }
 0x2d1   :  { %495 = vrot.lane.b32.xlu1 %v2917_v27, %s3078_s22 }
 0x343   :  { %v496_v28 = vpop.permute.xlu1 %495 }
 0x344   :  { %v498_v29 = vmul.f32 %v2915_v21, %v496_v28 }
 0x346   :  { %500 = vrot.lane.b32.xlu1 %v498_v29, %s3079_s23 }
 0x3b8   :  { %v3385_v30 = vpop.permute.xlu1 %500 }
 0x3b9   :  { %2739 = vmatmul.mubr.msk.f32.vlgmr.msra.gmra.mxu1 %vm271_vm2, %v3385_v30 }
 0x3ba   :  { %2742 = vmatpush3.msra.mxu1 %v3304_v36  ;;  %2745 = vmatprep.mubr.msk.f32.mxu1 %vm3075_vm1, %v3074_v1 }
 0x3bb   :  { %2743 = vmatprep.subr.mxu1 %v3074_v1 }
 0x3bc   :  { %2744 = vmatpush3.msra.mxu1 %v3311_v37 }
 0x3bd   :  { %2748 = vmatprep.subr.mxu1 %v3074_v1 }
 0x479   :  { %v570_v31 = vpop.f32.mrf.mxu1 }
 0x47a   :  { %v574_v32 = vadd.f32 %v570_v31, %v368_v62 }
 0x47b   :  { %v2740_v33 = vpop.f32.mrf.mxu1 }
 0x47c   :  { %2918 = vtanh.f32 %v574_v32  ;;  %v2544_v35 = vmul.f32 -1.442695, %v574_v32 }
 0x47e   :  { %2920 = vpow2.f32 %v2544_v35 }
 0x489   :  { %v2919_v34 = vpop.eup %2918 }
 0x48a   :  { %584 = vrot.lane.b32.xlu0 %v2919_v34, %s3076_s20 }
 0x48b   :  { %v2921_v38 = vpop.eup %2920 }
 0x48c   :  { %v578_v39 = vadd.f32 1.0, %v2921_v38 }
 0x48e   :  { %2922 = vrcp.f32 %v578_v39 }
 0x49b   :  { %v2923_v40 = vpop.eup %2922 }
 0x49c   :  { %v582_v43 = vmul.f32 %v2923_v40, %v492_v26 }
 0x4fc   :  { %v585_v41 = vpop.permute.xlu0 %584 }
 0x4fd   :  { %v587_v42 = vmul.f32 %v2923_v40, %v585_v41 }
 0x4ff   :  { %589 = vrot.lane.b32.xlu1 %v587_v42, %s3077_s21 }
 0x571   :  { %v590_v44 = vpop.permute.xlu1 %589 }
 0x572   :  { %v592_v45 = vadd.f32 %v590_v44, %v582_v43 }
 0x574   :  { %2924 = vtanh.f32 %v592_v45 }
 0x581   :  { %v2925_v46 = vpop.eup %2924 }
 0x582   :  { %595 = vrot.lane.b32.xlu0 %v2925_v46, %s3078_s22 }
 0x5f4   :  { %v596_v47 = vpop.permute.xlu0 %595 }
 0x5f5   :  { %v598_v48 = vmul.f32 %v2923_v40, %v596_v47 }
 0x5f7   :  { %600 = vrot.lane.b32.xlu1 %v598_v48, %s3079_s23 }
 0x669   :  { %v3399_v49 = vpop.permute.xlu1 %600 }
 0x66a   :  { %2746 = vmatmul.mubr.msk.f32.vlgmr.msra.gmra.mxu1 %vm271_vm2, %v3399_v49 }
 0x66b   :  { %2749 = vmatpush3.msra.mxu1 %v3304_v36  ;;  %2752 = vmatprep.mubr.msk.f32.mxu1 %vm3075_vm1, %v3074_v1 }
 0x66c   :  { %2750 = vmatprep.subr.mxu1 %v3074_v1 }
 0x66d   :  { %2751 = vmatpush3.msra.mxu1 %v3311_v37 }
 0x66e   :  { %2755 = vmatprep.subr.mxu1 %v3074_v1 }
 0x72a   :  { %v670_v50 = vpop.f32.mrf.mxu1 }
 0x72b   :  { %v674_v51 = vadd.f32 %v670_v50, %v3371_v4 }
 0x72c   :  { %v2747_v52 = vpop.f32.mrf.mxu1 }
 0x72d   :  { %2926 = vtanh.f32 %v674_v51  ;;  %v2546_v54 = vmul.f32 -1.442695, %v674_v51 }
 0x72f   :  { %2928 = vpow2.f32 %v2546_v54 }
 0x73a   :  { %v2927_v53 = vpop.eup %2926 }
 0x73b   :  { %684 = vrot.lane.b32.xlu0 %v2927_v53, %s3076_s20 }
 0x73c   :  { %v2929_v55 = vpop.eup %2928 }
 0x73d   :  { %v678_v56 = vadd.f32 1.0, %v2929_v55 }
 0x73f   :  { %2930 = vrcp.f32 %v678_v56 }
 0x74c   :  { %v2931_v57 = vpop.eup %2930 }
 0x74d   :  { %v682_v61 = vmul.f32 %v2931_v57, %v592_v45 }
 0x7ad   :  { %v685_v59 = vpop.permute.xlu0 %684 }
 0x7ae   :  { %v687_v60 = vmul.f32 %v2931_v57, %v685_v59 }
 0x7b0   :  { %689 = vrot.lane.b32.xlu1 %v687_v60, %s3077_s21 }
 0x822   :  { %v690_v62 = vpop.permute.xlu1 %689 }
 0x823   :  { %v692_v63 = vadd.f32 %v690_v62, %v682_v61  ;;  %v2557_v62 = vld [vmem:[%s3751_s5 + $0x10] sm:$0xff] }
 0x825   :  { %2932 = vtanh.f32 %v692_v63 }
 0x832   :  { %v2933_v0 = vpop.eup %2932 }
 0x833   :  { %695 = vrot.lane.b32.xlu0 %v2933_v0, %s3078_s22 }
 0x8a5   :  { %v696_v3 = vpop.permute.xlu0 %695 }
 0x8a6   :  { %v698_v4 = vmul.f32 %v2931_v57, %v696_v3  ;;  %v2558_v57 = vld [vmem:[%s3751_s5 + $0x18] sm:$0xff] }
 0x8a7   :  { %2783 = vmatprep.subr.mxu0 %v2558_v57 }
 0x8a8   :  { %700 = vrot.lane.b32.xlu1 %v698_v4, %s3079_s23 }
 0x91a   :  { %v3414_v5 = vpop.permute.xlu1 %700 }
 0x91b   :  { %2753 = vmatmul.mubr.msk.f32.vlgmr.msra.gmra.mxu1 %vm271_vm2, %v3414_v5 }
 0x91c   :  { %2756 = vmatpush3.msra.mxu1 %v3304_v36  ;;  %2759 = vmatprep.mubr.msk.f32.mxu1 %vm3075_vm1, %v3074_v1 }
 0x91d   :  { %2757 = vmatprep.subr.mxu1 %v3074_v1 }
 0x91e   :  { %2758 = vmatpush3.msra.mxu1 %v3311_v37 }
 0x91f   :  { %2762 = vmatprep.subr.mxu1 %v3074_v1 }
 0x9db   :  { %v770_v7 = vpop.f32.mrf.mxu1 }
 0x9dc   :  { %v774_v9 = vadd.f32 %v770_v7, %v3369_v2 }
 0x9dd   :  { %v2754_v11 = vpop.f32.mrf.mxu1 }
 0x9de   :  { %2934 = vtanh.f32 %v774_v9  ;;  %v2548_v14 = vmul.f32 -1.442695, %v774_v9 }
 0x9e0   :  { %2936 = vpow2.f32 %v2548_v14 }
 0x9eb   :  { %v2935_v12 = vpop.eup %2934 }
 0x9ec   :  { %784 = vrot.lane.b32.xlu0 %v2935_v12, %s3076_s20 }
 0x9ed   :  { %v2937_v15 = vpop.eup %2936 }
 0x9ee   :  { %v778_v16 = vadd.f32 1.0, %v2937_v15 }
 0x9f0   :  { %2938 = vrcp.f32 %v778_v16  ;;  %v3484_v16 = vld [vmem:[%s3752_s6 + $0x18] sm:$0xff] }
 0x9fd   :  { %v2939_v17 = vpop.eup %2938 }
 0x9fe   :  { %v782_v20 = vmul.f32 %v2939_v17, %v692_v63 }
 0xa5e   :  { %v785_v18 = vpop.permute.xlu0 %784 }
 0xa5f   :  { %v787_v19 = vmul.f32 %v2939_v17, %v785_v18 }
 0xa61   :  { %789 = vrot.lane.b32.xlu1 %v787_v19, %s3077_s21 }
 0xad3   :  { %v790_v21 = vpop.permute.xlu1 %789 }
 0xad4   :  { %v792_v22 = vadd.f32 %v790_v21, %v782_v20 }
 0xad6   :  { %2940 = vtanh.f32 %v792_v22 }
 0xae3   :  { %v2941_v2 = vpop.eup %2940 }
 0xae4   :  { %795 = vrot.lane.b32.xlu0 %v2941_v2, %s3078_s22 }
 0xb56   :  { %v796_v23 = vpop.permute.xlu0 %795 }
 0xb57   :  { %v798_v24 = vmul.f32 %v2939_v17, %v796_v23  ;;  %v3490_v17 = vld [vmem:[%s3752_s6 + $0x10] sm:$0xff] }
 0xb59   :  { %800 = vrot.lane.b32.xlu1 %v798_v24, %s3079_s23  ;;  %v3517_v24 = vld [vmem:[%s3753_s7 + $0x1] ss:$0 sm:$0xff] }
 0xbcb   :  { %v3429_v25 = vpop.permute.xlu1 %800 }
 0xbcc   :  { %2760 = vmatmul.mubr.msk.f32.vlgmr.msra.gmra.mxu1 %vm271_vm2, %v3429_v25 }
 0xbcd   :  { %2763 = vmatpush3.msra.mxu1 %v3304_v36  ;;  %2766 = vmatprep.mubr.msk.f32.mxu1 %vm3075_vm1, %v3074_v1 }
 0xbce   :  { %2764 = vmatprep.subr.mxu1 %v3074_v1 }
 0xbcf   :  { %2765 = vmatpush3.msra.mxu1 %v3311_v37 }
 0xbd0   :  { %2776 = vmatprep.subr.mxu1 %v3074_v1 }
 0xc8c   :  { %v870_v26 = vpop.f32.mrf.mxu1 }
 0xc8d   :  { %v874_v27 = vadd.f32 %v870_v26, %v3375_v8 }
 0xc8e   :  { %v2761_v28 = vpop.f32.mrf.mxu1 }
 0xc8f   :  { %2942 = vtanh.f32 %v874_v27  ;;  %v2550_v31 = vmul.f32 -1.442695, %v874_v27 }
 0xc91   :  { %2944 = vpow2.f32 %v2550_v31 }
 0xc9c   :  { %v2943_v29 = vpop.eup %2942 }
 0xc9d   :  { %884 = vrot.lane.b32.xlu0 %v2943_v29, %s3076_s20 }
 0xc9e   :  { %v2945_v32 = vpop.eup %2944 }
 0xc9f   :  { %v878_v33 = vadd.f32 1.0, %v2945_v32 }
 0xca1   :  { %2946 = vrcp.f32 %v878_v33 }
 0xcae   :  { %v2947_v34 = vpop.eup %2946 }
 0xcaf   :  { %v882_v39 = vmul.f32 %v2947_v34, %v792_v22 }
 0xd0f   :  { %v885_v35 = vpop.permute.xlu0 %884 }
 0xd10   :  { %v887_v38 = vmul.f32 %v2947_v34, %v885_v35 }
 0xd12   :  { %889 = vrot.lane.b32.xlu1 %v887_v38, %s3077_s21 }
 0xd84   :  { %v890_v40 = vpop.permute.xlu1 %889 }
 0xd85   :  { %v892_v41 = vadd.f32 %v890_v40, %v882_v39 }
 0xd87   :  { %2948 = vtanh.f32 %v892_v41 }
 0xd94   :  { %v2949_v8 = vpop.eup %2948 }
 0xd95   :  { %895 = vrot.lane.b32.xlu0 %v2949_v8, %s3078_s22 }
 0xe07   :  { %v896_v42 = vpop.permute.xlu0 %895 }
 0xe08   :  { %v898_v43 = vmul.f32 %v2947_v34, %v896_v42 }
 0xe0a   :  { %900 = vrot.lane.b32.xlu1 %v898_v43, %s3079_s23 }
 0xe7c   :  { %v901_v44 = vpop.permute.xlu1 %900 }
 0xe7d   :  { %2767 = vmatmul.mubr.msk.f32.vlgmr.msra.gmra.mxu1 %vm271_vm2, %v901_v44 }
 0xe7e   :  { %2777 = vmatpush3.msra.mxu1 %v3304_v36  ;;  %2780 = vmatprep.mubr.msk.f32.mxu1 %vm3075_vm1, %v3074_v1 }
 0xe7f   :  { %2778 = vmatprep.subr.mxu1 %v3074_v1 }
 0xe80   :  { %2779 = vmatpush3.msra.mxu1 %v3311_v37 }
 0xe81   :  { %2799 = vmatprep.subr.mxu1 %v3074_v1 }
 0xf3d   :  { %v970_v45 = vpop.f32.mrf.mxu1 }
 0xf3e   :  { %v974_v46 = vadd.f32 %v970_v45, %v3373_v6 }
 0xf3f   :  { %v2768_v47 = vpop.f32.mrf.mxu1 }
 0xf40   :  { %2950 = vtanh.f32 %v974_v46  ;;  %v2552_v50 = vmul.f32 -1.442695, %v974_v46 }
 0xf42   :  { %2952 = vpow2.f32 %v2552_v50 }
 0xf4d   :  { %v2951_v48 = vpop.eup %2950 }
 0xf4e   :  { %984 = vrot.lane.b32.xlu0 %v2951_v48, %s3076_s20 }
 0xf4f   :  { %v2953_v36 = vpop.eup %2952 }
 0xf50   :  { %v978_v51 = vadd.f32 1.0, %v2953_v36 }
 0xf52   :  { %2954 = vrcp.f32 %v978_v51 }
 0xf5f   :  { %v2955_v52 = vpop.eup %2954 }
 0xf60   :  { %v982_v37 = vmul.f32 %v2955_v52, %v892_v41 }
 0xfc0   :  { %v985_v53 = vpop.permute.xlu0 %984 }
 0xfc1   :  { %v987_v54 = vmul.f32 %v2955_v52, %v985_v53 }
 0xfc3   :  { %989 = vrot.lane.b32.xlu1 %v987_v54, %s3077_s21 }
0x1035   :  { %v990_v55 = vpop.permute.xlu1 %989 }
0x1036   :  { %v992_v56 = vadd.f32 %v990_v55, %v982_v37 }
0x1038   :  { %2956 = vtanh.f32 %v992_v56 }
0x1045   :  { %v2957_v6 = vpop.eup %2956 }
0x1046   :  { %995 = vrot.lane.b32.xlu0 %v2957_v6, %s3078_s22 }
0x10b8   :  { %v996_v59 = vpop.permute.xlu0 %995 }
0x10b9   :  { %v998_v60 = vmul.f32 %v2955_v52, %v996_v59 }
0x10bb   :  { %1000 = vrot.lane.b32.xlu1 %v998_v60, %s3079_s23 }
0x112d   :  { %v1001_v61 = vpop.permute.xlu1 %1000 }
0x112e   :  { %2774 = vmatmul.mubr.msk.f32.vlgmr.msra.gmra.mxu0 %vm271_vm2, %v1001_v61 }
0x112f   :  { %2784 = vmatpush3.msra.mxu0 %v2558_v57  ;;  %2787 = vmatprep.mubr.msk.f32.mxu0 %vm271_vm2, %v3385_v30 }
0x1130   :  { %2785 = vmatprep.subr.mxu0 %v2557_v62 }
0x1131   :  { %2786 = vmatpush3.msra.mxu0 %v2557_v62 }
0x1132   :  { %2788 = vmatmul.mubr.msk.f32.vlgmr.msra.gmra.mxu0 %vm271_vm2, %v3399_v49  ;;  %2827 = vmatprep.subr.mxu0 %v3074_v1 }
0x1133   :  { %2790 = vmatprep.mubr.msk.f32.mxu0 %vm271_vm2, %v3414_v5  ;;  %2828 = vmatpush3.msra.mxu0 %v3484_v16 }
0x1134   :  { %2829 = vmatprep.subr.mxu0 %v3074_v1 }
0x1135   :  { %2830 = vmatpush3.msra.mxu0 %v3490_v17 }
0x1136   :  { %2791 = vmatmul.mubr.msk.f32.gmra.mxu0 %vm271_vm2, %v3429_v25  ;;  %2841 = vmatprep.subr.mxu0 %v3074_v1 }
0x1137   :  { %2793 = vmatprep.mubr.msk.f32.mxu0 %vm271_vm2, %v901_v44 }
0x113a   :  { %2794 = vmatmul.mubr.msk.f32.gmra.mxu0 %vm271_vm2, %v1001_v61 }
0x11ee   :  { %v1070_v63 = vpop.f32.mrf.mxu0 }
0x11ef   :  { %v1074_v30 = vadd.f32 %v1070_v63, %v3379_v13 }
0x11f0   :  { %v2775_v0 = vpop.f32.mrf.mxu0 }
0x11f1   :  { %2958 = vtanh.f32 %v1074_v30  ;;  %v2554_v49 = vmul.f32 -1.442695, %v1074_v30 }
0x11f2   :  { %v2789_v21 = vpop.f32.mrf.mxu0 }
0x11f3   :  { %2960 = vpow2.f32 %v2554_v49  ;;  %v1290_v45 = vadd.f32 %v2789_v21, %v3517_v24 }
0x11f4   :  { %v1284_v22 = vpop.f32.mrf.mxu0 }
0x11f5   :  { %v1285_v26 = vadd.f32 %v3517_v24, %v1284_v22 }
0x11f6   :  { %v2792_v62 = vpop.f32.mrf.mxu0 }
0x11f8   :  { %v1294_v63 = vpop.f32.mrf.mxu0 }
0x11f9   :  { %v1295_v30 = vadd.f32 %v3517_v24, %v1294_v63 }
0x11fe   :  { %v2959_v3 = vpop.eup %2958 }
0x11ff   :  { %1084 = vrot.lane.b32.xlu0 %v2959_v3, %s3076_s20 }
0x1200   :  { %v2961_v4 = vpop.eup %2960 }
0x1201   :  { %v1078_v7 = vadd.f32 1.0, %v2961_v4 }
0x1203   :  { %2962 = vrcp.f32 %v1078_v7 }
0x1210   :  { %v2963_v5 = vpop.eup %2962 }
0x1211   :  { %v1082_v12 = vmul.f32 %v2963_v5, %v992_v56 }
0x1271   :  { %v1085_v9 = vpop.permute.xlu0 %1084 }
0x1272   :  { %v1087_v11 = vmul.f32 %v2963_v5, %v1085_v9 }
0x1274   :  { %1089 = vrot.lane.b32.xlu1 %v1087_v11, %s3077_s21 }
0x12e6   :  { %v1090_v14 = vpop.permute.xlu1 %1089 }
0x12e7   :  { %v3477_v15 = vadd.f32 %v1090_v14, %v1082_v12 }
0x12e9   :  { %2964 = vtanh.f32 %v3477_v15 }
0x12f6   :  { %v2965_v13 = vpop.eup %2964 }
0x12f7   :  { %1095 = vrot.lane.b32.xlu0 %v2965_v13, %s3078_s22 }
0x1369   :  { %v1096_v18 = vpop.permute.xlu0 %1095 }
0x136a   :  { %v1098_v19 = vmul.f32 %v2963_v5, %v1096_v18 }
0x136c   :  { %1100 = vrot.lane.b32.xlu1 %v1098_v19, %s3079_s23 }
0x13de   :  { %v1101_v20 = vpop.permute.xlu1 %1100 }
0x13df   :  { %2781 = vmatmul.mubr.msk.f32.vlgmr.msra.gmra.mxu1 %vm271_vm2, %v1101_v20  ;;  %2796 = vmatprep.mubr.msk.f32.mxu0 %vm271_vm2, %v1101_v20 }
0x13e0   :  { %2800 = vmatpush3.msra.mxu1 %v3484_v16  ;;  %2803 = vmatprep.mubr.msk.f32.mxu1 %vm3075_vm1, %v3074_v1 }
0x13e1   :  { %2801 = vmatprep.subr.mxu1 %v3074_v1 }
0x13e2   :  { %2802 = vmatpush3.msra.mxu1 %v3490_v17 }
0x13e3   :  { %2804 = vmatmul.mubr.f32.vlgmr.msra.gmra.mxu1 %v3074_v1  ;;  %2806 = vmatprep.subr.mxu1 %v3074_v1 }
0x13e4   :  { %2807 = vmatpush3.msra.mxu1 %v3484_v16  ;;  %2810 = vmatprep.mubr.msk.f32.mxu1 %vm3075_vm1, %v3074_v1 }
0x13e5   :  { %2808 = vmatprep.subr.mxu1 %v3074_v1 }
0x13e6   :  { %2809 = vmatpush3.msra.mxu1 %v3490_v17 }
0x13e7   :  { %2813 = vmatprep.subr.mxu1 %v3074_v1 }
0x149f   :  { %v1170_v2 = vpop.f32.mrf.mxu1 }
0x14a0   :  { %v3512_v23 = vadd.f32 %v1170_v2, %v3377_v10 }
0x14a1   :  { %v2782_v25 = vpop.f32.mrf.mxu1 }
0x14a2   :  { %v2556_v22 = vmul.f32 -1.442695, %v3512_v23 }
0x14a3   :  { %v1389_v27 = vpop.f32.mrf.mxu1 }
0x14a4   :  { %v1393_v28 = vadd.f32 %v1389_v27, %v1285_v26 }
0x14a5   :  { %v2805_v29 = vpop.f32.mrf.mxu1 }
0x14a6   :  { %2966 = vtanh.f32 %v1393_v28  ;;  %v2571_v32 = vmul.f32 -1.442695, %v1393_v28 }
0x14a8   :  { %2968 = vpow2.f32 %v2571_v32 }
0x14b3   :  { %v2967_v31 = vpop.eup %2966 }
0x14b4   :  { %1403 = vrot.lane.b32.xlu0 %v2967_v31, %s3076_s20 }
0x14b5   :  { %v2969_v33 = vpop.eup %2968 }
0x14b6   :  { %v1397_v10 = vadd.f32 1.0, %v2969_v33 }
0x14b8   :  { %2970 = vrcp.f32 %v1397_v10 }
0x14c5   :  { %v2971_v34 = vpop.eup %2970 }
0x14c6   :  { %v1401_v39 = vmul.f32 0.0, %v2971_v34 }
0x1526   :  { %v1404_v35 = vpop.permute.xlu0 %1403 }
0x1527   :  { %v1406_v38 = vmul.f32 %v2971_v34, %v1404_v35 }
0x1529   :  { %1408 = vrot.lane.b32.xlu1 %v1406_v38, %s3077_s21 }
0x159b   :  { %v1409_v40 = vpop.permute.xlu1 %1408 }
0x159c   :  { %v1411_v41 = vadd.f32 %v1409_v40, %v1401_v39 }
0x159e   :  { %2972 = vtanh.f32 %v1411_v41 }
0x15ab   :  { %v2973_v8 = vpop.eup %2972 }
0x15ac   :  { %1414 = vrot.lane.b32.xlu0 %v2973_v8, %s3078_s22 }
0x161e   :  { %v1415_v42 = vpop.permute.xlu0 %1414 }
0x161f   :  { %v1417_v43 = vmul.f32 %v2971_v34, %v1415_v42 }
0x1621   :  { %1419 = vrot.lane.b32.xlu1 %v1417_v43, %s3079_s23 }
0x1693   :  { %v1420_v44 = vpop.permute.xlu1 %1419 }
0x1694   :  { %2811 = vmatmul.mubr.msk.f32.vlgmr.msra.gmra.mxu1 %vm271_vm2, %v1420_v44 }
0x1695   :  { %2814 = vmatpush3.msra.mxu1 %v3484_v16  ;;  %2817 = vmatprep.mubr.msk.f32.mxu1 %vm3075_vm1, %v3074_v1 }
0x1696   :  { %2815 = vmatprep.subr.mxu1 %v3074_v1 }
0x1697   :  { %2816 = vmatpush3.msra.mxu1 %v3490_v17 }
0x1698   :  { %2820 = vmatprep.subr.mxu1 %v3074_v1 }
0x1754   :  { %v1489_v46 = vpop.f32.mrf.mxu1 }
0x1755   :  { %v1493_v47 = vadd.f32 %v1489_v46, %v1290_v45 }
0x1756   :  { %v2812_v48 = vpop.f32.mrf.mxu1 }
0x1757   :  { %2974 = vtanh.f32 %v1493_v47  ;;  %v2573_v36 = vmul.f32 -1.442695, %v1493_v47 }
0x1759   :  { %2976 = vpow2.f32 %v2573_v36 }
0x1764   :  { %v2975_v50 = vpop.eup %2974 }
0x1765   :  { %1503 = vrot.lane.b32.xlu0 %v2975_v50, %s3076_s20 }
0x1766   :  { %v2977_v51 = vpop.eup %2976 }
0x1767   :  { %v1497_v52 = vadd.f32 1.0, %v2977_v51 }
0x1769   :  { %2978 = vrcp.f32 %v1497_v52 }
0x1776   :  { %v2979_v53 = vpop.eup %2978 }
0x1777   :  { %v1501_v55 = vmul.f32 %v2979_v53, %v1411_v41 }
0x17d7   :  { %v1504_v54 = vpop.permute.xlu0 %1503 }
0x17d8   :  { %v1506_v37 = vmul.f32 %v2979_v53, %v1504_v54 }
0x17da   :  { %1508 = vrot.lane.b32.xlu1 %v1506_v37, %s3077_s21 }
0x184c   :  { %v1509_v56 = vpop.permute.xlu1 %1508 }
0x184d   :  { %v1511_v6 = vadd.f32 %v1509_v56, %v1501_v55  ;;  %v2795_v55 = vpop.f32.mrf.mxu0 }
0x184f   :  { %2980 = vtanh.f32 %v1511_v6  ;;  %v1304_v56 = vpop.f32.mrf.mxu0 }
0x185c   :  { %v2981_v57 = vpop.eup %2980 }
0x185d   :  { %1514 = vrot.lane.b32.xlu0 %v2981_v57, %s3078_s22 }
0x18cf   :  { %v1515_v59 = vpop.permute.xlu0 %1514 }
0x18d0   :  { %v1517_v60 = vmul.f32 %v2979_v53, %v1515_v59  ;;  %v1305_v59 = vadd.f32 %v3517_v24, %v1304_v56 }
0x18d2   :  { %1519 = vrot.lane.b32.xlu1 %v1517_v60, %s3079_s23 }
0x1944   :  { %v1520_v61 = vpop.permute.xlu1 %1519 }
0x1945   :  { %2818 = vmatmul.mubr.msk.f32.vlgmr.msra.gmra.mxu1 %vm271_vm2, %v1520_v61 }
0x1946   :  { %2821 = vmatpush3.msra.mxu1 %v3484_v16  ;;  %2824 = vmatprep.mubr.msk.f32.mxu1 %vm3075_vm1, %v3074_v1 }
0x1947   :  { %2822 = vmatprep.subr.mxu1 %v3074_v1 }
0x1948   :  { %2823 = vmatpush3.msra.mxu1 %v3490_v17 }
0x1949   :  { %2834 = vmatprep.subr.mxu1 %v3074_v1 }
0x1a05   :  { %v1589_v0 = vpop.f32.mrf.mxu1 }
0x1a06   :  { %v1593_v3 = vadd.f32 %v1589_v0, %v1295_v30 }
0x1a07   :  { %v2819_v49 = vpop.f32.mrf.mxu1 }
0x1a08   :  { %2982 = vtanh.f32 %v1593_v3  ;;  %v2575_v7 = vmul.f32 -1.442695, %v1593_v3 }
0x1a0a   :  { %2984 = vpow2.f32 %v2575_v7 }
0x1a15   :  { %v2983_v4 = vpop.eup %2982 }
0x1a16   :  { %1603 = vrot.lane.b32.xlu0 %v2983_v4, %s3076_s20 }
0x1a17   :  { %v2985_v5 = vpop.eup %2984 }
0x1a18   :  { %v1597_v9 = vadd.f32 1.0, %v2985_v5 }
0x1a1a   :  { %2986 = vrcp.f32 %v1597_v9 }
0x1a27   :  { %v2987_v11 = vpop.eup %2986 }
0x1a28   :  { %v1601_v13 = vmul.f32 %v2987_v11, %v1511_v6 }
0x1a88   :  { %v1604_v12 = vpop.permute.xlu0 %1603 }
0x1a89   :  { %v1606_v14 = vmul.f32 %v2987_v11, %v1604_v12 }
0x1a8b   :  { %1608 = vrot.lane.b32.xlu1 %v1606_v14, %s3077_s21 }
0x1afd   :  { %v1609_v18 = vpop.permute.xlu1 %1608 }
0x1afe   :  { %v1611_v19 = vadd.f32 %v1609_v18, %v1601_v13 }
0x1b00   :  { %2988 = vtanh.f32 %v1611_v19 }
0x1b01   :  { %2990 = vtanh.f32 %v3512_v23 }
0x1b02   :  { %2992 = vpow2.f32 %v2556_v22 }
0x1b0d   :  { %v2989_v20 = vpop.eup %2988 }
0x1b0e   :  { %1614 = vrot.lane.b32.xlu0 %v2989_v20, %s3078_s22  ;;  %v2991_v21 = vpop.eup %2990 }
0x1b0f   :  { %v2993_v2 = vpop.eup %2992 }
0x1b10   :  { %v1178_v25 = vadd.f32 1.0, %v2993_v2 }
0x1b12   :  { %1184 = vrot.lane.b32.xlu0 %v2991_v21, %s3076_s20  ;;  %2994 = vrcp.f32 %v1178_v25 }
0x1b1f   :  { %v2995_v28 = vpop.eup %2994 }
0x1b20   :  { %v1182_v23 = vmul.f32 %v2995_v28, %v3477_v15  ;;  %v1300_v15 = vadd.f32 %v2792_v62, %v3517_v24 }
0x1b80   :  { %v1615_v26 = vpop.permute.xlu0 %1614 }
0x1b81   :  { %v1617_v27 = vmul.f32 %v2987_v11, %v1615_v26 }
0x1b83   :  { %1619 = vrot.lane.b32.xlu1 %v1617_v27, %s3079_s23 }
0x1b84   :  { %v1185_v29 = vpop.permute.xlu0 %1184 }
0x1b85   :  { %v1187_v31 = vmul.f32 %v2995_v28, %v1185_v29 }
0x1b87   :  { %1189 = vrot.lane.b32.xlu0 %v1187_v31, %s3077_s21 }
0x1bf5   :  { %v1620_v32 = vpop.permute.xlu1 %1619 }
0x1bf6   :  { %2825 = vmatmul.mubr.msk.f32.vlgmr.msra.gmra.mxu1 %vm271_vm2, %v1620_v32 }
0x1bf7   :  { %2835 = vmatpush3.msra.mxu1 %v3484_v16  ;;  %2838 = vmatprep.mubr.msk.f32.mxu1 %vm3075_vm1, %v3074_v1 }
0x1bf8   :  { %2836 = vmatprep.subr.mxu1 %v3074_v1 }
0x1bf9   :  { %v1190_v33 = vpop.permute.xlu0 %1189  ;;  %2837 = vmatpush3.msra.mxu1 %v3490_v17 }
0x1bfa   :  { %v3559_v10 = vadd.f32 %v1190_v33, %v1182_v23  ;;  %2848 = vmatprep.subr.mxu1 %v3074_v1 }
0x1bfc   :  { %2996 = vtanh.f32 %v3559_v10 }
0x1c09   :  { %v2997_v34 = vpop.eup %2996 }
0x1c0a   :  { %1195 = vrot.lane.b32.xlu0 %v2997_v34, %s3078_s22 }
0x1c7c   :  { %v1196_v35 = vpop.permute.xlu0 %1195 }
0x1c7d   :  { %v1198_v38 = vmul.f32 %v2995_v28, %v1196_v35 }
0x1c7f   :  { %1214 = vrot.lane.b32.xlu0 %v1198_v38, %s3079_s23 }
0x1cb6   :  { %v1689_v39 = vpop.f32.mrf.mxu1 }
0x1cb7   :  { %v1693_v40 = vadd.f32 %v1689_v39, %v1300_v15 }
0x1cb8   :  { %v2826_v41 = vpop.f32.mrf.mxu1 }
0x1cb9   :  { %2998 = vtanh.f32 %v1693_v40  ;;  %v2577_v43 = vmul.f32 -1.442695, %v1693_v40 }
0x1cbb   :  { %3000 = vpow2.f32 %v2577_v43 }
0x1cc6   :  { %v2999_v8 = vpop.eup %2998 }
0x1cc7   :  { %1703 = vrot.lane.b32.xlu1 %v2999_v8, %s3076_s20 }
0x1cc8   :  { %v3001_v44 = vpop.eup %3000 }
0x1cc9   :  { %v1697_v45 = vadd.f32 1.0, %v3001_v44 }
0x1ccb   :  { %3002 = vrcp.f32 %v1697_v45 }
0x1cd8   :  { %v3003_v46 = vpop.eup %3002 }
0x1cd9   :  { %v1701_v50 = vmul.f32 %v3003_v46, %v1611_v19  ;;  %v1310_v19 = vadd.f32 %v2795_v55, %v3517_v24 }
0x1cf1   :  { %v3567_v42 = vpop.permute.xlu0 %1214 }
0x1cf2   :  { %2797 = vmatmul.mubr.msk.f32.gmra.mxu0 %vm271_vm2, %v3567_v42 }
0x1cf3   :  { %2831 = vmatprep.mubr.msk.f32.mxu0 %vm3075_vm1, %v3074_v1 }
0x1d39   :  { %v1704_v47 = vpop.permute.xlu1 %1703 }
0x1d3a   :  { %v1706_v48 = vmul.f32 %v3003_v46, %v1704_v47 }
0x1d3c   :  { %1708 = vrot.lane.b32.xlu1 %v1706_v48, %s3077_s21 }
0x1dae   :  { %v1709_v36 = vpop.permute.xlu1 %1708 }
0x1daf   :  { %v1711_v51 = vadd.f32 %v1709_v36, %v1701_v50 }
0x1db1   :  { %3004 = vtanh.f32 %v1711_v51 }
0x1db2   :  { %v3583_v6 = vpop.f32.mrf.mxu0 }
0x1db4   :  { %v1314_v57 = vpop.f32.mrf.mxu0 }
0x1db5   :  { %v1315_v38 = vadd.f32 %v3517_v24, %v1314_v57 }
0x1dbe   :  { %v3005_v52 = vpop.eup %3004 }
0x1dbf   :  { %1714 = vrot.lane.b32.xlu1 %v3005_v52, %s3078_s22 }
0x1e31   :  { %v1715_v53 = vpop.permute.xlu1 %1714 }
0x1e32   :  { %v1717_v54 = vmul.f32 %v3003_v46, %v1715_v53 }
0x1e34   :  { %1719 = vrot.lane.b32.xlu1 %v1717_v54, %s3079_s23 }
0x1ea6   :  { %v1720_v37 = vpop.permute.xlu1 %1719 }
0x1ea7   :  { %2832 = vmatmul.mubr.msk.f32.vlgmr.msra.gmra.mxu0 %vm271_vm2, %v1720_v37  ;;  %v1320_v37 = vadd.f32 %v3583_v6, %v3517_v24 }
0x1ea8   :  { %2842 = vmatpush3.msra.mxu0 %v3484_v16  ;;  %2845 = vmatprep.mubr.msk.f32.mxu0 %vm3075_vm1, %v3074_v1 }
0x1ea9   :  { %2843 = vmatprep.subr.mxu0 %v3074_v1 }
0x1eaa   :  { %2844 = vmatpush3.msra.mxu0 %v3490_v17 }
0x1eab   :  { %2855 = vmatprep.subr.mxu0 %v3074_v1 }
0x1f67   :  { %v1789_v60 = vpop.f32.mrf.mxu0 }
0x1f68   :  { %v1793_v61 = vadd.f32 %v1789_v60, %v1305_v59 }
0x1f69   :  { %v2833_v62 = vpop.f32.mrf.mxu0 }
0x1f6a   :  { %3006 = vtanh.f32 %v1793_v61  ;;  %v2579_v30 = vmul.f32 -1.442695, %v1793_v61 }
0x1f6c   :  { %3008 = vpow2.f32 %v2579_v30 }
0x1f77   :  { %v3007_v63 = vpop.eup %3006 }
0x1f78   :  { %1803 = vrot.lane.b32.xlu0 %v3007_v63, %s3076_s20 }
0x1f79   :  { %v3009_v0 = vpop.eup %3008 }
0x1f7a   :  { %v1797_v3 = vadd.f32 1.0, %v3009_v0 }
0x1f7c   :  { %3010 = vrcp.f32 %v1797_v3 }
0x1f89   :  { %v3011_v49 = vpop.eup %3010 }
0x1f8a   :  { %v1801_v5 = vmul.f32 %v3011_v49, %v1711_v51 }
0x1fea   :  { %v1804_v4 = vpop.permute.xlu0 %1803 }
0x1feb   :  { %v1806_v7 = vmul.f32 %v3011_v49, %v1804_v4  ;;  %v2139_v4 = vld [vmem:[%s3754_s8 + $0x38] sm:$0xff] }
0x1fed   :  { %1808 = vrot.lane.b32.xlu1 %v1806_v7, %s3077_s21  ;;  %v2138_v7 = vld [vmem:[%s3754_s8 + $0x30] sm:$0xff] }
0x205f   :  { %v1809_v9 = vpop.permute.xlu1 %1808 }
0x2060   :  { %v1811_v11 = vadd.f32 %v1809_v9, %v1801_v5  ;;  %v2137_v5 = vld [vmem:[%s3754_s8 + $0x28] sm:$0xff]  ;;  %v2136_v9 = vld [vmem:[%s3754_s8 + $0x20] sm:$0xff] }
0x2062   :  { %3012 = vtanh.f32 %v1811_v11 }
0x206f   :  { %v3013_v12 = vpop.eup %3012 }
0x2070   :  { %1814 = vrot.lane.b32.xlu0 %v3013_v12, %s3078_s22  ;;  %v2134_v12 = vld [vmem:[%s3754_s8 + $0x10] sm:$0xff] }
0x20e2   :  { %v1815_v14 = vpop.permute.xlu0 %1814 }
0x20e3   :  { %v1817_v13 = vmul.f32 %v3011_v49, %v1815_v14 }
0x20e5   :  { %1819 = vrot.lane.b32.xlu1 %v1817_v13, %s3079_s23  ;;  %v2133_v13 = vld [vmem:[%s3754_s8 + $0x8] sm:$0xff] }
0x2157   :  { %v1820_v18 = vpop.permute.xlu1 %1819 }
0x2158   :  { %2839 = vmatmul.mubr.msk.f32.vlgmr.msra.gmra.mxu1 %vm271_vm2, %v1820_v18 }
0x2159   :  { %2849 = vmatpush3.msra.mxu1 %v3484_v16  ;;  %2852 = vmatprep.mubr.msk.f32.mxu1 %vm3075_vm1, %v3074_v1 }
0x215a   :  { %2850 = vmatprep.subr.mxu1 %v3074_v1 }
0x215b   :  { %2851 = vmatpush3.msra.mxu1 %v3490_v17 }
0x2218   :  { %v1889_v20 = vpop.f32.mrf.mxu1 }
0x2219   :  { %v1893_v21 = vadd.f32 %v1889_v20, %v1310_v19  ;;  %v2132_v19 = vld [vmem:[%s3754_s8] sm:$0xff] }
0x221a   :  { %v2840_v22 = vpop.f32.mrf.mxu1  ;;  %v2531_v20 = vld [vmem:[%s3750_s4] ss:$0 sm:$0xff] }
0x221b   :  { %3014 = vtanh.f32 %v1893_v21  ;;  %v2581_v25 = vmul.f32 -1.442695, %v1893_v21  ;;  %v234_v21 = vadd.f32 %v2531_v20, %v3364_v58  ;;  %v2224_v58 = vld [vmem:[%s3756_s10 + $0x20] sm:$0xff] }
0x221d   :  { %3016 = vpow2.f32 %v2581_v25  ;;  %v237_v22 = vmul.f32 %v234_v21, %v234_v21  ;;  %v2227_v25 = vld [vmem:[%s3756_s10 + $0x38] sm:$0xff] }
0x221e   :  { %2267 = vmatprep.subr.mxu1 %v2227_v25 }
0x2228   :  { %v3015_v2 = vpop.eup %3014 }
0x2229   :  { %1903 = vrot.lane.b32.xlu0 %v3015_v2, %s3076_s20  ;;  %v239_v2 = vsel %vm238_vm3, %v237_v22, 0.0 }
0x222a   :  { %v3017_v26 = vpop.eup %3016 }
0x222b   :  { %v1897_v16 = vadd.f32 1.0, %v3017_v26  ;;  %v2226_v26 = vld [vmem:[%s3756_s10 + $0x30] sm:$0xff] }
0x222d   :  { %3018 = vrcp.f32 %v1897_v16  ;;  %v2225_v16 = vld [vmem:[%s3756_s10 + $0x28] sm:$0xff] }
0x223a   :  { %v3019_v27 = vpop.eup %3018 }
0x223b   :  { %v1901_v17 = vmul.f32 %v3019_v27, %v1811_v11  ;;  %v2135_v11 = vld [vmem:[%s3754_s8 + $0x18] sm:$0xff] }
0x229b   :  { %v1904_v28 = vpop.permute.xlu0 %1903 }
0x229c   :  { %v1906_v29 = vmul.f32 %v3019_v27, %v1904_v28  ;;  %v2222_v28 = vld [vmem:[%s3756_s10 + $0x10] sm:$0xff] }
0x229e   :  { %1908 = vrot.lane.b32.xlu1 %v1906_v29, %s3077_s21  ;;  %v2221_v29 = vld [vmem:[%s3756_s10 + $0x8] sm:$0xff] }
0x2310   :  { %v1909_v31 = vpop.permute.xlu1 %1908 }
0x2311   :  { %v1911_v32 = vadd.f32 %v1909_v31, %v1901_v17  ;;  %v2220_v17 = vld [vmem:[%s3756_s10] sm:$0xff]  ;;  %v2596_v31 = vld [vmem:[%s3756_s10 + $0x78] sm:$0xff] }
0x2313   :  { %3020 = vtanh.f32 %v1911_v32 }
0x2320   :  { %v3021_v23 = vpop.eup %3020 }
0x2321   :  { %1914 = vrot.lane.b32.xlu0 %v3021_v23, %s3078_s22 }
0x2393   :  { %v1915_v33 = vpop.permute.xlu0 %1914 }
0x2394   :  { %v1917_v34 = vmul.f32 %v3019_v27, %v1915_v33  ;;  %v2223_v27 = vld [vmem:[%s3756_s10 + $0x18] sm:$0xff] }
0x2396   :  { %1919 = vrot.lane.b32.xlu1 %v1917_v34, %s3079_s23 }
0x2408   :  { %v1920_v35 = vpop.permute.xlu1 %1919 }
0x2409   :  { %2846 = vmatmul.mubr.msk.f32.vlgmr.msra.gmra.mxu0 %vm271_vm2, %v1920_v35 }
0x240a   :  { %2871 = vmatprep.mubr.msk.f32.mxu0 %vm3075_vm1, %v3074_v1  ;;  %2856 = vmatpush3.msra.mxu0 %v2139_v4 }
0x240b   :  { %2857 = vmatprep.subr.mxu0 %v3074_v1 }
0x240c   :  { %2858 = vmatpush3.msra.mxu0 %v2138_v7 }
0x240d   :  { %2859 = vmatprep.subr.mxu0 %v3074_v1 }
0x240e   :  { %2860 = vmatpush3.msra.mxu0 %v2137_v5 }
0x240f   :  { %2861 = vmatprep.subr.mxu0 %v3074_v1 }
0x2410   :  { %2862 = vmatpush3.msra.mxu0 %v2136_v9  ;;  %v2434_v9 = vld [vmem:[%s3758_s12 + $0x18] sm:$0xff] }
0x2411   :  { %2863 = vmatprep.subr.mxu0 %v3074_v1 }
0x2412   :  { %2864 = vmatpush3.msra.mxu0 %v2135_v11  ;;  %v2433_v11 = vld [vmem:[%s3758_s12 + $0x10] sm:$0xff] }
0x2413   :  { %2865 = vmatprep.subr.mxu0 %v3074_v1 }
0x2414   :  { %2866 = vmatpush3.msra.mxu0 %v2134_v12 }
0x2415   :  { %2867 = vmatprep.subr.mxu0 %v3074_v1 }
0x2416   :  { %2868 = vmatpush3.msra.mxu0 %v2133_v13  ;;  %v2431_v13 = vld [vmem:[%s3758_s12] sm:$0xff] }
0x2417   :  { %2869 = vmatprep.subr.mxu0 %v3074_v1 }
0x2418   :  { %2870 = vmatpush3.msra.mxu0 %v2132_v19 }
0x2419   :  { %2874 = vmatprep.subr.mxu0 %v3074_v1 }
0x24c9   :  { %v1989_v15 = vpop.f32.mrf.mxu0 }
0x24ca   :  { %v1993_v39 = vadd.f32 %v1989_v15, %v1315_v38 }
0x24cb   :  { %v2847_v40 = vpop.f32.mrf.mxu0 }
0x24cc   :  { %3022 = vtanh.f32 %v1993_v39  ;;  %v2583_v8 = vmul.f32 -1.442695, %v1993_v39 }
0x24ce   :  { %3024 = vpow2.f32 %v2583_v8  ;;  %v2592_v8 = vld [vmem:[%s3756_s10 + $0x58] sm:$0xff] }
0x24d9   :  { %v3023_v41 = vpop.eup %3022 }
0x24da   :  { %2003 = vrot.lane.b32.xlu0 %v3023_v41, %s3076_s20  ;;  %v2593_v41 = vld [vmem:[%s3756_s10 + $0x60] sm:$0xff] }
0x24db   :  { %v3025_v43 = vpop.eup %3024 }
0x24dc   :  { %v1997_v44 = vadd.f32 1.0, %v3025_v43  ;;  %v2591_v43 = vld [vmem:[%s3756_s10 + $0x50] sm:$0xff] }
0x24de   :  { %3026 = vrcp.f32 %v1997_v44  ;;  %v2590_v44 = vld [vmem:[%s3756_s10 + $0x48] sm:$0xff] }
0x24eb   :  { %v3027_v45 = vpop.eup %3026 }
0x24ec   :  { %v2001_v48 = vmul.f32 %v3027_v45, %v1911_v32  ;;  %v2127_v32 = vsel %vm271_vm2, %v3567_v42, %v3559_v10  ;;  %v2595_v10 = vld [vmem:[%s3756_s10 + $0x70] sm:$0xff]  ;;  %v2594_v42 = vld [vmem:[%s3756_s10 + $0x68] sm:$0xff] }
0x254c   :  { %v2004_v46 = vpop.permute.xlu0 %2003 }
0x254d   :  { %v2006_v47 = vmul.f32 %v3027_v45, %v2004_v46  ;;  %v2230_v46 = vlaneseq }
0x254f   :  { %2008 = vrot.lane.b32.xlu1 %v2006_v47, %s3077_s21  ;;  %v2231_v47 = vshrl.u32 %v2230_v46, 7 }
0x25c1   :  { %v2009_v50 = vpop.permute.xlu1 %2008 }
0x25c2   :  { %v2011_v36 = vadd.f32 %v2009_v50, %v2001_v48  ;;  %v2236_v48 = vsub.s32 1, %v2231_v47  ;;  %v2228_v50 = vld [vmem:[%s3757_s11] sm:$0x3] }
0x25c4   :  { %3028 = vtanh.f32 %v2011_v36 }
0x25d1   :  { %v3029_v51 = vpop.eup %3028 }
0x25d2   :  { %2014 = vrot.lane.b32.xlu0 %v3029_v51, %s3078_s22  ;;  %v2586_v51 = vld [vmem:[%s3755_s9] ss:$0 sm:$0xff] }
0x2644   :  { %v2015_v52 = vpop.permute.xlu0 %2014 }
0x2645   :  { %v2017_v53 = vmul.f32 %v3027_v45, %v2015_v52  ;;  %v2589_v45 = vld [vmem:[%s3756_s10 + $0x40] sm:$0xff] }
0x2647   :  { %2019 = vrot.lane.b32.xlu1 %v2017_v53, %s3079_s23 }
0x26b9   :  { %v2020_v54 = vpop.permute.xlu1 %2019 }
0x26ba   :  { %2853 = vmatmul.mubr.msk.f32.vlgmr.msra.gmra.mxu1 %vm271_vm2, %v2020_v54 }
0x26bb   :  { %2307 = vmatprep.mubr.f32.mxu1 %v3074_v1  ;;  %2268 = vmatpush1.msra.mxu1 %v2226_v26 }
0x26bc   :  { %2269 = vmatprep.subr.mxu1 %v2225_v16  ;;  %v2599_v16 = vld [vmem:[%s3759_s13] ss:$0 sm:$0xff] }
0x26bd   :  { %2270 = vmatpush1.msra.mxu1 %v2224_v58 }
0x26be   :  { %2271 = vmatprep.subr.mxu1 %v2223_v27 }
0x26bf   :  { %2272 = vmatpush1.msra.mxu1 %v2222_v28 }
0x26c0   :  { %2273 = vmatprep.subr.mxu1 %v2221_v29 }
0x26c1   :  { %2274 = vmatpush1.msra.mxu1 %v2220_v17 }
0x26c2   :  { %2365 = vmatprep.subr.mxu1 %v2596_v31 }
0x277a   :  { %v2089_v55 = vpop.f32.mrf.mxu1 }
0x277b   :  { %v2093_v56 = vadd.f32 %v2089_v55, %v1320_v37  ;;  %v2232_v37 = vsub.s32 0, %v2231_v47 }
0x277c   :  { %v2854_v57 = vpop.f32.mrf.mxu1 }
0x277d   :  { %3030 = vtanh.f32 %v2093_v56  ;;  %v2585_v60 = vmul.f32 -1.442695, %v2093_v56  ;;  %v2233_v56 = vrot.slane %v2228_v50, %v2232_v37  ;;  %v2597_v57 = vld [vmem:[%s3757_s11 + $0x2] sm:$0x3] }
0x277f   :  { %3032 = vpow2.f32 %v2585_v60  ;;  %v2331_v60 = vrot.slane %v2597_v57, %v2232_v37 }
0x278a   :  { %v3031_v59 = vpop.eup %3030 }
0x278b   :  { %2103 = vrot.lane.b32.xlu0 %v3031_v59, %s3076_s20 }
0x278c   :  { %v3033_v61 = vpop.eup %3032 }
0x278d   :  { %v2097_v62 = vadd.f32 1.0, %v3033_v61 }
0x278f   :  { %3034 = vrcp.f32 %v2097_v62  ;;  %v2335_v62 = vrot.slane %v2597_v57, %v2236_v48 }
0x279c   :  { %v3035_v63 = vpop.eup %3034 }
0x279d   :  { %v2101_v3 = vmul.f32 %v3035_v63, %v2011_v36  ;;  %v2237_v36 = vrot.slane %v2228_v50, %v2236_v48 }
0x27fd   :  { %v2104_v30 = vpop.permute.xlu0 %2103 }
0x27fe   :  { %v2106_v0 = vmul.f32 %v3035_v63, %v2104_v30 }
0x2800   :  { %2108 = vrot.lane.b32.xlu1 %v2106_v0, %s3077_s21 }
0x2872   :  { %v2109_v49 = vpop.permute.xlu1 %2108 }
0x2873   :  { %v2111_v24 = vadd.f32 %v2109_v49, %v2101_v3 }
0x2875   :  { %3036 = vtanh.f32 %v2111_v24 }
0x2882   :  { %v3037_v6 = vpop.eup %3036 }
0x2883   :  { %2114 = vrot.lane.b32.xlu0 %v3037_v6, %s3078_s22 }
0x2887   :  { %2124 = vrot.lane.b32.xlu0 %v2111_v24, %s3078_s22 }
0x28f5   :  { %v2115_v14 = vpop.permute.xlu0 %2114 }
0x28f6   :  { %v2117_v18 = vmul.f32 %v3035_v63, %v2115_v14  ;;  %v2432_v14 = vld [vmem:[%s3758_s12 + $0x8] sm:$0xff] }
0x28f8   :  { %2120 = vrot.lane.b32.xlu1 %v2117_v18, %s3080_s28  ;;  %s3081_s28 = smov 64  }
0x28f9   :  { %v2125_v33 = vpop.permute.xlu0 %2124 }
0x291c   :  { %240 = vadd.xlane.f32.xlu1 %v239_v2 }
0x296a   :  { %v2121_v23 = vpop.permute.xlu1 %2120 }
0x296b   :  { %v2128_v34 = vsel %vm238_vm3, %v2127_v32, %v2121_v23 }
0x296c   :  { %v2130_v35 = vsel %vm2129_vm4, %v2128_v34, %v2125_v33 }
0x296d   :  { %3038 = vtanh.f32 %v2130_v35 }
0x297a   :  { %v3039_v38 = vpop.eup %3038 }
0x297b   :  { %2872 = vmatmul.mubr.msk.f32.vlgmr.msra.gmra.mxu0 %vm74_vm0, %v3039_v38 }
0x297c   :  { %2882 = vmatprep.mubr.msk.f32.mxu0 %vm3075_vm1, %v3074_v1  ;;  %2875 = vmatpush3.msra.mxu0 %v2434_v9 }
0x297d   :  { %2876 = vmatprep.subr.mxu0 %v3074_v1 }
0x297e   :  { %2877 = vmatpush3.msra.mxu0 %v2433_v11 }
0x297f   :  { %2878 = vmatprep.subr.mxu0 %v3074_v1 }
0x2980   :  { %2879 = vmatpush3.msra.mxu0 %v2432_v14 }
0x2981   :  { %2880 = vmatprep.subr.mxu0 %v3074_v1 }
0x2982   :  { %2881 = vmatpush3.msra.mxu0 %v2431_v13 }
0x29a5   :  { %v241_v15 = vpop.xlane.xlu1 %240 }
0x29a6   :  { %3040 = vrsqrt.f32 %v241_v15 }
0x29b3   :  { %v3041_v39 = vpop.eup %3040 }
0x29b4   :  { %v243_v40 = vmul.f32 %v3041_v39, %v234_v21 }
0x29b6   :  { %2588 = vmatmul.mubr.msk.f32.vlgmr.msra.gmra.mxu1 %vm238_vm3, %v243_v40 }
0x29b7   :  { %2366 = vmatpush1.msra.mxu1 %v2595_v10  ;;  %2405 = vmatprep.mubr.f32.mxu1 %v3074_v1 }
0x29b8   :  { %2367 = vmatprep.subr.mxu1 %v2594_v42 }
0x29b9   :  { %2368 = vmatpush1.msra.mxu1 %v2593_v41 }
0x29ba   :  { %2369 = vmatprep.subr.mxu1 %v2592_v8 }
0x29bb   :  { %2370 = vmatpush1.msra.mxu1 %v2591_v43 }
0x29bc   :  { %2371 = vmatprep.subr.mxu1 %v2590_v44 }
0x29bd   :  { %2372 = vmatpush1.msra.mxu1 %v2589_v45 }
0x2a3b   :  { %v2216_v52 = vpop.f32.mrf.mxu0 }
0x2a3c   :  { %v2217_v53 = vadd.f32 %v2586_v51, %v2216_v52 }
0x2a3d   :  { %v2873_v54 = vpop.f32.mrf.mxu0 }
0x2a3e   :  { %2598 = vmatmul.mubr.msk.f32.vlgmr.msra.gmra.mxu1 %vm238_vm3, %v2217_v53 }
0x2a76   :  { %v2309_v55 = vpop.f32.mrf.mxu1 }
0x2a77   :  { %v2310_v61 = vadd.f32 %v2309_v55, %v2233_v56 }
0x2a78   :  { %v2311_v59 = vpop.f32.mrf.mxu1 }
0x2a79   :  { %v2312_v63 = vadd.f32 %v2311_v59, %v2237_v36  ;;  %3042 = vtanh.f32 %v2310_v61 }
0x2a86   :  { %v3043_v24 = vpop.eup %3042 }
0x2afe   :  { %v2407_v30 = vpop.f32.mrf.mxu1 }
0x2aff   :  { %v2408_v0 = vadd.f32 %v2407_v30, %v2331_v60 }
0x2b00   :  { %v2409_v3 = vpop.f32.mrf.mxu1 }
0x2b01   :  { %3044 = vtanh.f32 %v2408_v0  ;;  %v2410_v49 = vadd.f32 %v2409_v3, %v2335_v62 }
0x2b02   :  { %3046 = vtanh.f32 %v2312_v63 }
0x2b03   :  { %3048 = vtanh.f32 %v2410_v49 }
0x2b0e   :  { %v3045_v6 = vpop.eup %3044 }
0x2b0f   :  { %v3047_v4 = vpop.eup %3046  ;;  %v2414_v7 = vmul.f32 %v3045_v6, %v3043_v24 }
0x2b10   :  { %v3049_v5 = vpop.eup %3048 }
0x2b11   :  { %2417 = vrot.lane.b32.xlu0 %v2414_v7, %s3076_s20  ;;  %v2415_v12 = vmul.f32 %v3049_v5, %v3047_v4 }
0x2b15   :  { %2421 = vrot.lane.b32.xlu0 %v2414_v7, %s3081_s28 }
0x2b19   :  { %2425 = vrot.lane.b32.xlu0 %v2414_v7, %s3078_s22  ;;  %s3052_s22 = scalar_lea.vmem %s2523_s30, 128 }
0x2b1a   :  { %p3053_p0 = scmp.ne.s32.totalorder %s2523_s30, %s3052_s22  ;;  %p3058_p2 = scmp.lt.s32.totalorder %s3052_s22, %s3052_s22 }
0x2b1c   :  { %p3059_p3 = por %p3058_p2, %p3057_p1 }
0x2b1e   :  { %p3060_p4 = pnand %p3059_p3, %p3053_p0 }
0x2b83   :  { %v2418_v18 = vpop.permute.xlu0 %2417 }
0x2b84   :  { %v2420_v20 = vadd.f32 %v2418_v18, %v2414_v7 }
0x2b87   :  { %v2422_v19 = vpop.permute.xlu0 %2421 }
0x2b88   :  { %v2424_v21 = vadd.f32 %v2422_v19, %v2420_v20 }
0x2b8b   :  { %v2426_v22 = vpop.permute.xlu0 %2425 }
0x2b8c   :  { %v2428_v2 = vadd.f32 %v2426_v22, %v2424_v21 }
0x2b8e   :  { %v2429_v25 = vadd.f32 %v2428_v2, %v2415_v12 }
0x2b90   :  { %3050 = vtanh.f32 %v2429_v25 }
0x2b9d   :  { %v3051_v26 = vpop.eup %3050 }
0x2b9e   :  { %2883 = vmatmul.mubr.msk.f32.vlgmr.msra.gmra.mxu0 %vm238_vm3, %v3051_v26 }
0x2c5e   :  { %v2511_v1 = vpop.f32.mrf.mxu0 }
0x2c5f   :  { %v2512_v58 = vadd.f32 %v2599_v16, %v2511_v1 }
0x2c60   :  { %v2884_v27 = vpop.f32.mrf.mxu0 }
0x2c61   :  { %2515 = vst.msk [vmem:[#allocation2] sm:$0xff] %vm271_vm2, %v2512_v58 }
0x2c62   :  { %3063 = shalt.err (!%p3060_p4)
}
0x2c63   :  { %2525 = dma.vmem_to_hbm [thread:$0]  %s2523_s30, 128, %s3760_s14, [#allocation3]  }
0x2c64   :  { %3072 = dma.done.wait [#allocation3], 128  }
0x2c65   :  { %3073 = vsyncadd [#allocation3], 4294967168 }
0x2c66   :  { %2529 = vsyncpa [#allocation3], 1 }

</bundles_post_ra>
